<compile_context>
chip_gen: v7x
topology: tpu7x:2x2x1
jax: 0.10.0
libtpu: 0.0.40
codegen_flags: <defaults>
</compile_context>

<pallas_src>
import numpy as np
import jax
import jax.numpy as jnp
from jax.experimental import pallas as pl
from jax.experimental.pallas import tpu as pltpu


# ----------------------------------------------------------------------------
# Config (small, deterministic)
# ----------------------------------------------------------------------------
N_LAYERS    = 2
N_HEADS     = 4
D_MODEL     = 32
D_HEAD      = 8
D_MLP       = 64
D_VOCAB     = 12
D_VOCAB_O   = 12
N_CTX       = 16
SEQ         = 8
BATCH       = 2
INIT_STD    = 0.02
SOFT_CAP    = 0.0          # output_logits_soft_cap == 0 -> branch skipped (as in forward())

VOCAB_PAD   = 16           # pad embedding one-hot contraction dim to a multiple of 8
VOCAB_O_PAD = 128          # pad logits to a full 128-lane store (sliced back in wrapper)


# ----------------------------------------------------------------------------
# Single fused kernel: whole forward pass for the whole (flattened) batch.
# ----------------------------------------------------------------------------
def make_fused_kernel(n_layers, n_heads, d_head):
    hd = n_heads * d_head
    inv_scale = 1.0 / float(np.sqrt(d_head))

    def kernel(tok_ref, we_ref, pos_ref, mask_ref, *refs):
        layer_refs = refs[:4 * n_layers]
        (win_ref, bin_ref, wout_ref, bout_ref,
         wu_ref, bu_ref, o_ref) = refs[4 * n_layers:]

        n_rows    = tok_ref.shape[0]          # B*S
        vocab_pad = we_ref.shape[0]

        # ---- Embed as a one-hot matmul (MXU, no gather); pos addend is a
        #      precomputed (N, d_model) slab passed in from the wrapper. ------
        tok = tok_ref[...]                                            # (N, 1) int32
        tok_oh = (tok == jax.lax.broadcasted_iota(
            jnp.int32, (n_rows, vocab_pad), 1)).astype(jnp.float32)   # (N, Vpad)
        x = (jnp.dot(tok_oh, we_ref[...], preferred_element_type=jnp.float32)
             + pos_ref[...])

        # precomputed block-diagonal additive mask (keeps softmax per-sequence)
        mask_bias = mask_ref[...]                                     # (N, N)

        # ---- attention layers (NO residual, per reference) ------------------
        for l in range(n_layers):
            wqkv_ref, bqkv_ref, wo_ref, bo_ref = layer_refs[4 * l: 4 * l + 4]
            # fused Q/K/V projection across all heads: one (N,D)x(D,3*H*dh) matmul
            qkv = (jnp.dot(x, wqkv_ref[...], preferred_element_type=jnp.float32)
                   + bqkv_ref[...])                                   # (N, 3*hd)
            z_heads = []
            for h in range(n_heads):                                  # tiny static loop
                q = qkv[:,          h * d_head:          (h + 1) * d_head]
                k = qkv[:, hd     + h * d_head: hd     + (h + 1) * d_head]
                v = qkv[:, 2 * hd + h * d_head: 2 * hd + (h + 1) * d_head]
                # q @ k^T without an explicit transpose (contract last dims)
                s = (jax.lax.dot_general(
                        q, k, dimension_numbers=(((1,), (1,)), ((), ())),
                        preferred_element_type=jnp.float32) * inv_scale
                     + mask_bias)                                     # (N, N)
                m = jnp.max(s, axis=-1, keepdims=True)
                e = jnp.exp(s - m)
                denom = jnp.sum(e, axis=-1, keepdims=True)            # >= 1 (self-attend)
                # normalize AFTER the PV matmul: scales (N,dh) not (N,N),
                # reciprocal (EUP) overlaps the MXU matmul.
                z = jnp.dot(e, v, preferred_element_type=jnp.float32) # (N, dh)
                z_heads.append(z * pl.reciprocal(denom, approx=True))
            z_all = jnp.concatenate(z_heads, axis=1)                  # (N, H*dh)
            # single fused output projection (H*dh, d_model)
            x = (jnp.dot(z_all, wo_ref[...], preferred_element_type=jnp.float32)
                 + bo_ref[...])

        # ---- MLP (ReLU) + UnEmbed, all resident ------------------------------
        h1 = jnp.maximum(
            jnp.dot(x, win_ref[...], preferred_element_type=jnp.float32) + bin_ref[...],
            0.0)
        mid = jnp.dot(h1, wout_ref[...], preferred_element_type=jnp.float32) + bout_ref[...]
        logits = jnp.dot(mid, wu_ref[...], preferred_element_type=jnp.float32) + bu_ref[...]
        o_ref[...] = logits.astype(o_ref.dtype)       # (N, 128): lane-dense store

    return kernel


# ----------------------------------------------------------------------------
# Parameter init (mirrors init_weights: W_* ~ N(0, std), b_* = 0)
# ----------------------------------------------------------------------------
def init_params(key):
    keys = jax.random.split(key, 4 + 6 * N_LAYERS)
    ki = iter(keys)
    nrm = lambda shp: INIT_STD * jax.random.normal(next(ki), shp, jnp.float32)
    params = {
        "W_E":   nrm((D_VOCAB, D_MODEL)),
        "W_pos": nrm((N_CTX, D_MODEL)),
        "W_in":  nrm((D_MODEL, D_MLP)),
        "b_in":  jnp.zeros((D_MLP,), jnp.float32),
        "W_out": nrm((D_MLP, D_MODEL)),
        "b_out": jnp.zeros((D_MODEL,), jnp.float32),
        "W_U":   nrm((D_MODEL, D_VOCAB_O)),
        "b_U":   jnp.zeros((D_VOCAB_O,), jnp.float32),
        "layers": [],
    }
    for _ in range(N_LAYERS):
        params["layers"].append({
            "W_Q": nrm((N_HEADS, D_MODEL, D_HEAD)),
            "W_K": nrm((N_HEADS, D_MODEL, D_HEAD)),
            "W_V": nrm((N_HEADS, D_MODEL, D_HEAD)),
            "b_Q": jnp.zeros((N_HEADS, D_HEAD), jnp.float32),
            "b_K": jnp.zeros((N_HEADS, D_HEAD), jnp.float32),
            "b_V": jnp.zeros((N_HEADS, D_HEAD), jnp.float32),
            "W_O": nrm((N_HEADS, D_HEAD, D_MODEL)),
            "b_O": jnp.zeros((D_MODEL,), jnp.float32),
        })
    return params


def pack_params(params):
    """One-time weight re-layout for the fused kernel (fused heads, padded vocab)."""
    hd = N_HEADS * D_HEAD
    to2d = lambda w: jnp.transpose(w, (1, 0, 2)).reshape(D_MODEL, hd)  # (H,D,dh)->(D,H*dh)
    packed = {
        "W_E_pad": jnp.zeros((VOCAB_PAD, D_MODEL), jnp.float32).at[:D_VOCAB].set(params["W_E"]),
        "W_pos":   params["W_pos"],
        "W_in":    params["W_in"],
        "b_in":    params["b_in"].reshape(1, D_MLP),
        "W_out":   params["W_out"],
        "b_out":   params["b_out"].reshape(1, D_MODEL),
        "W_U_pad": jnp.zeros((D_MODEL, VOCAB_O_PAD), jnp.float32).at[:, :D_VOCAB_O].set(params["W_U"]),
        "b_U_pad": jnp.zeros((1, VOCAB_O_PAD), jnp.float32).at[:, :D_VOCAB_O].set(params["b_U"]),
        "layers": [],
    }
    for lp in params["layers"]:
        packed["layers"].append({
            "W_QKV":  jnp.concatenate([to2d(lp["W_Q"]), to2d(lp["W_K"]), to2d(lp["W_V"])], axis=1),
            "b_QKV":  jnp.concatenate([lp["b_Q"].reshape(-1), lp["b_K"].reshape(-1),
                                       lp["b_V"].reshape(-1)]).reshape(1, 3 * hd),
            # fused output projection: (H, dh, D) -> (H*dh, D), head-major rows
            # matching the head-major lane order of z_all in the kernel.
            "W_O2d":  lp["W_O"].reshape(hd, D_MODEL),
            "b_O":    lp["b_O"].reshape(1, D_MODEL),
        })
    return packed


# ----------------------------------------------------------------------------
# Pallas forward (single fused pallas_call) + pure-jnp reference for validation
# ----------------------------------------------------------------------------
def transformer_forward_pallas(packed, tokens):
    B, S = tokens.shape
    N = B * S
    tok_flat = tokens.reshape(N, 1).astype(jnp.int32)

    # Hoisted static tensors (tiny, DMA'd once into VMEM, overlap the prologue):
    # positional addend tiled over the batch, and the block-diagonal mask bias.
    pos_add = jnp.tile(packed["W_pos"][:S], (B, 1))                    # (N, D)
    seq_id = jnp.arange(N, dtype=jnp.int32) // S
    mask_bias = jnp.where(seq_id[:, None] == seq_id[None, :],
                          0.0, -1e30).astype(jnp.float32)              # (N, N)

    args = [tok_flat, packed["W_E_pad"], pos_add, mask_bias]
    for lp in packed["layers"]:
        args += [lp["W_QKV"], lp["b_QKV"], lp["W_O2d"], lp["b_O"]]
    args += [packed["W_in"], packed["b_in"], packed["W_out"], packed["b_out"],
             packed["W_U_pad"], packed["b_U_pad"]]

    vmem_spec = pl.BlockSpec(memory_space=pltpu.MemorySpace.VMEM)
    kernel = make_fused_kernel(n_layers=len(packed["layers"]),
                               n_heads=N_HEADS, d_head=D_HEAD)
    out_padded = pl.pallas_call(
        kernel,
        out_shape=jax.ShapeDtypeStruct((N, VOCAB_O_PAD), jnp.float32),
        in_specs=[vmem_spec] * len(args),
        out_specs=vmem_spec,
    )(*args)
    # TODO(synk): output_logits_soft_cap branch in the reference uses an undefined
    # `logits` variable when triggered; SOFT_CAP=0.0 so it is skipped here too.
    return out_padded[:, :D_VOCAB_O].reshape(B, S, D_VOCAB_O)


def transformer_forward_ref(params, tokens):
    B, S = tokens.shape
    x = params["W_E"][tokens] + params["W_pos"][:S][None, :, :]
    scale = np.sqrt(D_HEAD)
    for lp in params["layers"]:
        q = jnp.einsum("bsm,hmd->bhsd", x, lp["W_Q"]) + lp["b_Q"][None, :, None, :]
        k = jnp.einsum("bsm,hmd->bhsd", x, lp["W_K"]) + lp["b_K"][None, :, None, :]
        v = jnp.einsum("bsm,hmd->bhsd", x, lp["W_V"]) + lp["b_V"][None, :, None, :]
        s = jnp.einsum("bhqd,bhkd->bhqk", q, k) / scale
        p = jax.nn.softmax(s, axis=-1)
        p = jnp.where(jnp.isnan(p), 0.0, p)
        z = jnp.einsum("bhqk,bhkd->bhqd", p, v)
        x = jnp.einsum("bhqd,hdm->bqm", z, lp["W_O"]) + lp["b_O"]
    h = jax.nn.relu(x @ params["W_in"] + params["b_in"])
    x = h @ params["W_out"] + params["b_out"]
    return x @ params["W_U"] + params["b_U"]


if __name__ == "__main__":
    key = jax.random.PRNGKey(0)
    k_param, k_tok = jax.random.split(key)
    params = init_params(k_param)
    packed = pack_params(params)
    tokens = jax.random.randint(k_tok, (BATCH, SEQ), 0, D_VOCAB, dtype=jnp.int32)

    fwd = jax.jit(transformer_forward_pallas)
    out = jax.block_until_ready(fwd(packed, tokens))
    assert out.shape == (BATCH, SEQ, D_VOCAB_O), out.shape

    ref = jax.block_until_ready(transformer_forward_ref(params, tokens))
    np.testing.assert_allclose(np.asarray(out), np.asarray(ref), rtol=1e-2, atol=1e-2)

    print("KERNEL_OK")
</pallas_src>

<mosaic_0001>
module attributes {stable_mosaic.version = 11 : i64} {
  func.func @kernel(%arg0: memref<16x1xi32, #tpu.memory_space<vmem>>, %arg1: memref<16x32xf32, #tpu.memory_space<vmem>>, %arg2: memref<16x32xf32, #tpu.memory_space<vmem>>, %arg3: memref<16x16xf32, #tpu.memory_space<vmem>>, %arg4: memref<32x96xf32, #tpu.memory_space<vmem>>, %arg5: memref<1x96xf32, #tpu.memory_space<vmem>>, %arg6: memref<32x32xf32, #tpu.memory_space<vmem>>, %arg7: memref<1x32xf32, #tpu.memory_space<vmem>>, %arg8: memref<32x96xf32, #tpu.memory_space<vmem>>, %arg9: memref<1x96xf32, #tpu.memory_space<vmem>>, %arg10: memref<32x32xf32, #tpu.memory_space<vmem>>, %arg11: memref<1x32xf32, #tpu.memory_space<vmem>>, %arg12: memref<32x64xf32, #tpu.memory_space<vmem>>, %arg13: memref<1x64xf32, #tpu.memory_space<vmem>>, %arg14: memref<64x32xf32, #tpu.memory_space<vmem>>, %arg15: memref<1x32xf32, #tpu.memory_space<vmem>>, %arg16: memref<32x128xf32, #tpu.memory_space<vmem>>, %arg17: memref<1x128xf32, #tpu.memory_space<vmem>>, %arg18: memref<16x128xf32, #tpu.memory_space<vmem>>) attributes {dimension_semantics = [], scalar_prefetch = 0 : i64, scratch_operands = 0 : i64, tpu.core_type = #tpu.core_type<tc>} {
    %c0 = arith.constant 0 : index
    %c0_0 = arith.constant 0 : index
    %0 = vector.load %arg0[%c0, %c0_0] : memref<16x1xi32, #tpu.memory_space<vmem>>, vector<16x1xi32>
    %1 = tpu.iota {dimensions = array<i32: 1>} : vector<16x16xi32>
    %2 = vector.broadcast %0 : vector<16x1xi32> to vector<16x16xi32>
    %3 = arith.cmpi eq, %2, %1 : vector<16x16xi32>
    %4 = arith.extui %3 : vector<16x16xi1> to vector<16x16xi32>
    %5 = arith.sitofp %4 : vector<16x16xi32> to vector<16x16xf32>
    %c0_1 = arith.constant 0 : index
    %c0_2 = arith.constant 0 : index
    %6 = vector.load %arg1[%c0_1, %c0_2] : memref<16x32xf32, #tpu.memory_space<vmem>>, vector<16x32xf32>
    %cst = arith.constant dense<0.000000e+00> : vector<16x32xf32>
    %7 = tpu.matmul %5, %6, %cst {dimension_numbers = #tpu.dot_dimension_numbers<[1], [0], [0], [1], [0, 0, 1, 1], [], []>} : vector<16x16xf32>, vector<16x32xf32>, vector<16x32xf32> -> vector<16x32xf32>
    %c0_3 = arith.constant 0 : index
    %c0_4 = arith.constant 0 : index
    %8 = vector.load %arg2[%c0_3, %c0_4] : memref<16x32xf32, #tpu.memory_space<vmem>>, vector<16x32xf32>
    %9 = arith.addf %7, %8 : vector<16x32xf32>
    %c0_5 = arith.constant 0 : index
    %c0_6 = arith.constant 0 : index
    %10 = vector.load %arg3[%c0_5, %c0_6] : memref<16x16xf32, #tpu.memory_space<vmem>>, vector<16x16xf32>
    %c0_7 = arith.constant 0 : index
    %c0_8 = arith.constant 0 : index
    %11 = vector.load %arg4[%c0_7, %c0_8] : memref<32x96xf32, #tpu.memory_space<vmem>>, vector<32x96xf32>
    %cst_9 = arith.constant dense<0.000000e+00> : vector<16x96xf32>
    %12 = tpu.matmul %9, %11, %cst_9 {dimension_numbers = #tpu.dot_dimension_numbers<[1], [0], [0], [1], [0, 0, 1, 1], [], []>} : vector<16x32xf32>, vector<32x96xf32>, vector<16x96xf32> -> vector<16x96xf32>
    %c0_10 = arith.constant 0 : index
    %c0_11 = arith.constant 0 : index
    %13 = vector.load %arg5[%c0_10, %c0_11] : memref<1x96xf32, #tpu.memory_space<vmem>>, vector<1x96xf32>
    %14 = vector.broadcast %13 : vector<1x96xf32> to vector<16x96xf32>
    %15 = arith.addf %12, %14 : vector<16x96xf32>
    %16 = vector.extract_strided_slice %15 {offsets = [0, 0], sizes = [16, 8], strides = [1, 1]} : vector<16x96xf32> to vector<16x8xf32>
    %17 = vector.extract_strided_slice %15 {offsets = [0, 32], sizes = [16, 8], strides = [1, 1]} : vector<16x96xf32> to vector<16x8xf32>
    %18 = vector.extract_strided_slice %15 {offsets = [0, 64], sizes = [16, 8], strides = [1, 1]} : vector<16x96xf32> to vector<16x8xf32>
    %cst_12 = arith.constant dense<0.000000e+00> : vector<16x16xf32>
    %19 = tpu.matmul %16, %17, %cst_12 {dimension_numbers = #tpu.dot_dimension_numbers<[1], [1], [0], [0], [0, 0, 1, 0], [], []>} : vector<16x8xf32>, vector<16x8xf32>, vector<16x16xf32> -> vector<16x16xf32>
    %cst_13 = arith.constant 0.353553385 : f32
    %20 = vector.broadcast %cst_13 : f32 to vector<16x16xf32>
    %21 = arith.mulf %19, %20 : vector<16x16xf32>
    %22 = arith.addf %21, %10 : vector<16x16xf32>
    %cst_14 = arith.constant dense<0xFF800000> : vector<16xf32>
    %23 = vector.multi_reduction <maximumf>, %22, %cst_14 [1] : vector<16x16xf32> to vector<16xf32>
    %24 = vector.shape_cast %23 : vector<16xf32> to vector<16x1xf32>
    %25 = vector.broadcast %24 : vector<16x1xf32> to vector<16x16xf32>
    %26 = arith.subf %22, %25 : vector<16x16xf32>
    %27 = math.exp %26 : vector<16x16xf32>
    %cst_15 = arith.constant dense<0.000000e+00> : vector<16xf32>
    %28 = vector.multi_reduction <add>, %27, %cst_15 [1] : vector<16x16xf32> to vector<16xf32>
    %29 = vector.shape_cast %28 : vector<16xf32> to vector<16x1xf32>
    %cst_16 = arith.constant dense<0.000000e+00> : vector<16x8xf32>
    %30 = tpu.matmul %27, %18, %cst_16 {dimension_numbers = #tpu.dot_dimension_numbers<[1], [0], [0], [1], [0, 0, 1, 1], [], []>} : vector<16x16xf32>, vector<16x8xf32>, vector<16x8xf32> -> vector<16x8xf32>
    %31 = tpu.reciprocal %29 {approx = true} : vector<16x1xf32> -> vector<16x1xf32>
    %32 = vector.broadcast %31 : vector<16x1xf32> to vector<16x8xf32>
    %33 = arith.mulf %30, %32 : vector<16x8xf32>
    %34 = vector.extract_strided_slice %15 {offsets = [0, 8], sizes = [16, 8], strides = [1, 1]} : vector<16x96xf32> to vector<16x8xf32>
    %35 = vector.extract_strided_slice %15 {offsets = [0, 40], sizes = [16, 8], strides = [1, 1]} : vector<16x96xf32> to vector<16x8xf32>
    %36 = vector.extract_strided_slice %15 {offsets = [0, 72], sizes = [16, 8], strides = [1, 1]} : vector<16x96xf32> to vector<16x8xf32>
    %cst_17 = arith.constant dense<0.000000e+00> : vector<16x16xf32>
    %37 = tpu.matmul %34, %35, %cst_17 {dimension_numbers = #tpu.dot_dimension_numbers<[1], [1], [0], [0], [0, 0, 1, 0], [], []>} : vector<16x8xf32>, vector<16x8xf32>, vector<16x16xf32> -> vector<16x16xf32>
    %cst_18 = arith.constant 0.353553385 : f32
    %38 = vector.broadcast %cst_18 : f32 to vector<16x16xf32>
    %39 = arith.mulf %37, %38 : vector<16x16xf32>
    %40 = arith.addf %39, %10 : vector<16x16xf32>
    %cst_19 = arith.constant dense<0xFF800000> : vector<16xf32>
    %41 = vector.multi_reduction <maximumf>, %40, %cst_19 [1] : vector<16x16xf32> to vector<16xf32>
    %42 = vector.shape_cast %41 : vector<16xf32> to vector<16x1xf32>
    %43 = vector.broadcast %42 : vector<16x1xf32> to vector<16x16xf32>
    %44 = arith.subf %40, %43 : vector<16x16xf32>
    %45 = math.exp %44 : vector<16x16xf32>
    %cst_20 = arith.constant dense<0.000000e+00> : vector<16xf32>
    %46 = vector.multi_reduction <add>, %45, %cst_20 [1] : vector<16x16xf32> to vector<16xf32>
    %47 = vector.shape_cast %46 : vector<16xf32> to vector<16x1xf32>
    %cst_21 = arith.constant dense<0.000000e+00> : vector<16x8xf32>
    %48 = tpu.matmul %45, %36, %cst_21 {dimension_numbers = #tpu.dot_dimension_numbers<[1], [0], [0], [1], [0, 0, 1, 1], [], []>} : vector<16x16xf32>, vector<16x8xf32>, vector<16x8xf32> -> vector<16x8xf32>
    %49 = tpu.reciprocal %47 {approx = true} : vector<16x1xf32> -> vector<16x1xf32>
    %50 = vector.broadcast %49 : vector<16x1xf32> to vector<16x8xf32>
    %51 = arith.mulf %48, %50 : vector<16x8xf32>
    %52 = vector.extract_strided_slice %15 {offsets = [0, 16], sizes = [16, 8], strides = [1, 1]} : vector<16x96xf32> to vector<16x8xf32>
    %53 = vector.extract_strided_slice %15 {offsets = [0, 48], sizes = [16, 8], strides = [1, 1]} : vector<16x96xf32> to vector<16x8xf32>
    %54 = vector.extract_strided_slice %15 {offsets = [0, 80], sizes = [16, 8], strides = [1, 1]} : vector<16x96xf32> to vector<16x8xf32>
    %cst_22 = arith.constant dense<0.000000e+00> : vector<16x16xf32>
    %55 = tpu.matmul %52, %53, %cst_22 {dimension_numbers = #tpu.dot_dimension_numbers<[1], [1], [0], [0], [0, 0, 1, 0], [], []>} : vector<16x8xf32>, vector<16x8xf32>, vector<16x16xf32> -> vector<16x16xf32>
    %cst_23 = arith.constant 0.353553385 : f32
    %56 = vector.broadcast %cst_23 : f32 to vector<16x16xf32>
    %57 = arith.mulf %55, %56 : vector<16x16xf32>
    %58 = arith.addf %57, %10 : vector<16x16xf32>
    %cst_24 = arith.constant dense<0xFF800000> : vector<16xf32>
    %59 = vector.multi_reduction <maximumf>, %58, %cst_24 [1] : vector<16x16xf32> to vector<16xf32>
    %60 = vector.shape_cast %59 : vector<16xf32> to vector<16x1xf32>
    %61 = vector.broadcast %60 : vector<16x1xf32> to vector<16x16xf32>
    %62 = arith.subf %58, %61 : vector<16x16xf32>
    %63 = math.exp %62 : vector<16x16xf32>
    %cst_25 = arith.constant dense<0.000000e+00> : vector<16xf32>
    %64 = vector.multi_reduction <add>, %63, %cst_25 [1] : vector<16x16xf32> to vector<16xf32>
    %65 = vector.shape_cast %64 : vector<16xf32> to vector<16x1xf32>
    %cst_26 = arith.constant dense<0.000000e+00> : vector<16x8xf32>
    %66 = tpu.matmul %63, %54, %cst_26 {dimension_numbers = #tpu.dot_dimension_numbers<[1], [0], [0], [1], [0, 0, 1, 1], [], []>} : vector<16x16xf32>, vector<16x8xf32>, vector<16x8xf32> -> vector<16x8xf32>
    %67 = tpu.reciprocal %65 {approx = true} : vector<16x1xf32> -> vector<16x1xf32>
    %68 = vector.broadcast %67 : vector<16x1xf32> to vector<16x8xf32>
    %69 = arith.mulf %66, %68 : vector<16x8xf32>
    %70 = vector.extract_strided_slice %15 {offsets = [0, 24], sizes = [16, 8], strides = [1, 1]} : vector<16x96xf32> to vector<16x8xf32>
    %71 = vector.extract_strided_slice %15 {offsets = [0, 56], sizes = [16, 8], strides = [1, 1]} : vector<16x96xf32> to vector<16x8xf32>
    %72 = vector.extract_strided_slice %15 {offsets = [0, 88], sizes = [16, 8], strides = [1, 1]} : vector<16x96xf32> to vector<16x8xf32>
    %cst_27 = arith.constant dense<0.000000e+00> : vector<16x16xf32>
    %73 = tpu.matmul %70, %71, %cst_27 {dimension_numbers = #tpu.dot_dimension_numbers<[1], [1], [0], [0], [0, 0, 1, 0], [], []>} : vector<16x8xf32>, vector<16x8xf32>, vector<16x16xf32> -> vector<16x16xf32>
    %cst_28 = arith.constant 0.353553385 : f32
    %74 = vector.broadcast %cst_28 : f32 to vector<16x16xf32>
    %75 = arith.mulf %73, %74 : vector<16x16xf32>
    %76 = arith.addf %75, %10 : vector<16x16xf32>
    %cst_29 = arith.constant dense<0xFF800000> : vector<16xf32>
    %77 = vector.multi_reduction <maximumf>, %76, %cst_29 [1] : vector<16x16xf32> to vector<16xf32>
    %78 = vector.shape_cast %77 : vector<16xf32> to vector<16x1xf32>
    %79 = vector.broadcast %78 : vector<16x1xf32> to vector<16x16xf32>
    %80 = arith.subf %76, %79 : vector<16x16xf32>
    %81 = math.exp %80 : vector<16x16xf32>
    %cst_30 = arith.constant dense<0.000000e+00> : vector<16xf32>
    %82 = vector.multi_reduction <add>, %81, %cst_30 [1] : vector<16x16xf32> to vector<16xf32>
    %83 = vector.shape_cast %82 : vector<16xf32> to vector<16x1xf32>
    %cst_31 = arith.constant dense<0.000000e+00> : vector<16x8xf32>
    %84 = tpu.matmul %81, %72, %cst_31 {dimension_numbers = #tpu.dot_dimension_numbers<[1], [0], [0], [1], [0, 0, 1, 1], [], []>} : vector<16x16xf32>, vector<16x8xf32>, vector<16x8xf32> -> vector<16x8xf32>
    %85 = tpu.reciprocal %83 {approx = true} : vector<16x1xf32> -> vector<16x1xf32>
    %86 = vector.broadcast %85 : vector<16x1xf32> to vector<16x8xf32>
    %87 = arith.mulf %84, %86 : vector<16x8xf32>
    %88 = tpu.concatenate %33, %51, %69, %87 in 1 : vector<16x8xf32>, vector<16x8xf32>, vector<16x8xf32>, vector<16x8xf32> -> vector<16x32xf32>
    %c0_32 = arith.constant 0 : index
    %c0_33 = arith.constant 0 : index
    %89 = vector.load %arg6[%c0_32, %c0_33] : memref<32x32xf32, #tpu.memory_space<vmem>>, vector<32x32xf32>
    %cst_34 = arith.constant dense<0.000000e+00> : vector<16x32xf32>
    %90 = tpu.matmul %88, %89, %cst_34 {dimension_numbers = #tpu.dot_dimension_numbers<[1], [0], [0], [1], [0, 0, 1, 1], [], []>} : vector<16x32xf32>, vector<32x32xf32>, vector<16x32xf32> -> vector<16x32xf32>
    %c0_35 = arith.constant 0 : index
    %c0_36 = arith.constant 0 : index
    %91 = vector.load %arg7[%c0_35, %c0_36] : memref<1x32xf32, #tpu.memory_space<vmem>>, vector<1x32xf32>
    %92 = vector.broadcast %91 : vector<1x32xf32> to vector<16x32xf32>
    %93 = arith.addf %90, %92 : vector<16x32xf32>
    %c0_37 = arith.constant 0 : index
    %c0_38 = arith.constant 0 : index
    %94 = vector.load %arg8[%c0_37, %c0_38] : memref<32x96xf32, #tpu.memory_space<vmem>>, vector<32x96xf32>
    %cst_39 = arith.constant dense<0.000000e+00> : vector<16x96xf32>
    %95 = tpu.matmul %93, %94, %cst_39 {dimension_numbers = #tpu.dot_dimension_numbers<[1], [0], [0], [1], [0, 0, 1, 1], [], []>} : vector<16x32xf32>, vector<32x96xf32>, vector<16x96xf32> -> vector<16x96xf32>
    %c0_40 = arith.constant 0 : index
    %c0_41 = arith.constant 0 : index
    %96 = vector.load %arg9[%c0_40, %c0_41] : memref<1x96xf32, #tpu.memory_space<vmem>>, vector<1x96xf32>
    %97 = vector.broadcast %96 : vector<1x96xf32> to vector<16x96xf32>
    %98 = arith.addf %95, %97 : vector<16x96xf32>
    %99 = vector.extract_strided_slice %98 {offsets = [0, 0], sizes = [16, 8], strides = [1, 1]} : vector<16x96xf32> to vector<16x8xf32>
    %100 = vector.extract_strided_slice %98 {offsets = [0, 32], sizes = [16, 8], strides = [1, 1]} : vector<16x96xf32> to vector<16x8xf32>
    %101 = vector.extract_strided_slice %98 {offsets = [0, 64], sizes = [16, 8], strides = [1, 1]} : vector<16x96xf32> to vector<16x8xf32>
    %cst_42 = arith.constant dense<0.000000e+00> : vector<16x16xf32>
    %102 = tpu.matmul %99, %100, %cst_42 {dimension_numbers = #tpu.dot_dimension_numbers<[1], [1], [0], [0], [0, 0, 1, 0], [], []>} : vector<16x8xf32>, vector<16x8xf32>, vector<16x16xf32> -> vector<16x16xf32>
    %cst_43 = arith.constant 0.353553385 : f32
    %103 = vector.broadcast %cst_43 : f32 to vector<16x16xf32>
    %104 = arith.mulf %102, %103 : vector<16x16xf32>
    %105 = arith.addf %104, %10 : vector<16x16xf32>
    %cst_44 = arith.constant dense<0xFF800000> : vector<16xf32>
    %106 = vector.multi_reduction <maximumf>, %105, %cst_44 [1] : vector<16x16xf32> to vector<16xf32>
    %107 = vector.shape_cast %106 : vector<16xf32> to vector<16x1xf32>
    %108 = vector.broadcast %107 : vector<16x1xf32> to vector<16x16xf32>
    %109 = arith.subf %105, %108 : vector<16x16xf32>
    %110 = math.exp %109 : vector<16x16xf32>
    %cst_45 = arith.constant dense<0.000000e+00> : vector<16xf32>
    %111 = vector.multi_reduction <add>, %110, %cst_45 [1] : vector<16x16xf32> to vector<16xf32>
    %112 = vector.shape_cast %111 : vector<16xf32> to vector<16x1xf32>
    %cst_46 = arith.constant dense<0.000000e+00> : vector<16x8xf32>
    %113 = tpu.matmul %110, %101, %cst_46 {dimension_numbers = #tpu.dot_dimension_numbers<[1], [0], [0], [1], [0, 0, 1, 1], [], []>} : vector<16x16xf32>, vector<16x8xf32>, vector<16x8xf32> -> vector<16x8xf32>
    %114 = tpu.reciprocal %112 {approx = true} : vector<16x1xf32> -> vector<16x1xf32>
    %115 = vector.broadcast %114 : vector<16x1xf32> to vector<16x8xf32>
    %116 = arith.mulf %113, %115 : vector<16x8xf32>
    %117 = vector.extract_strided_slice %98 {offsets = [0, 8], sizes = [16, 8], strides = [1, 1]} : vector<16x96xf32> to vector<16x8xf32>
    %118 = vector.extract_strided_slice %98 {offsets = [0, 40], sizes = [16, 8], strides = [1, 1]} : vector<16x96xf32> to vector<16x8xf32>
    %119 = vector.extract_strided_slice %98 {offsets = [0, 72], sizes = [16, 8], strides = [1, 1]} : vector<16x96xf32> to vector<16x8xf32>
    %cst_47 = arith.constant dense<0.000000e+00> : vector<16x16xf32>
    %120 = tpu.matmul %117, %118, %cst_47 {dimension_numbers = #tpu.dot_dimension_numbers<[1], [1], [0], [0], [0, 0, 1, 0], [], []>} : vector<16x8xf32>, vector<16x8xf32>, vector<16x16xf32> -> vector<16x16xf32>
    %cst_48 = arith.constant 0.353553385 : f32
    %121 = vector.broadcast %cst_48 : f32 to vector<16x16xf32>
    %122 = arith.mulf %120, %121 : vector<16x16xf32>
    %123 = arith.addf %122, %10 : vector<16x16xf32>
    %cst_49 = arith.constant dense<0xFF800000> : vector<16xf32>
    %124 = vector.multi_reduction <maximumf>, %123, %cst_49 [1] : vector<16x16xf32> to vector<16xf32>
    %125 = vector.shape_cast %124 : vector<16xf32> to vector<16x1xf32>
    %126 = vector.broadcast %125 : vector<16x1xf32> to vector<16x16xf32>
    %127 = arith.subf %123, %126 : vector<16x16xf32>
    %128 = math.exp %127 : vector<16x16xf32>
    %cst_50 = arith.constant dense<0.000000e+00> : vector<16xf32>
    %129 = vector.multi_reduction <add>, %128, %cst_50 [1] : vector<16x16xf32> to vector<16xf32>
    %130 = vector.shape_cast %129 : vector<16xf32> to vector<16x1xf32>
    %cst_51 = arith.constant dense<0.000000e+00> : vector<16x8xf32>
    %131 = tpu.matmul %128, %119, %cst_51 {dimension_numbers = #tpu.dot_dimension_numbers<[1], [0], [0], [1], [0, 0, 1, 1], [], []>} : vector<16x16xf32>, vector<16x8xf32>, vector<16x8xf32> -> vector<16x8xf32>
    %132 = tpu.reciprocal %130 {approx = true} : vector<16x1xf32> -> vector<16x1xf32>
    %133 = vector.broadcast %132 : vector<16x1xf32> to vector<16x8xf32>
    %134 = arith.mulf %131, %133 : vector<16x8xf32>
    %135 = vector.extract_strided_slice %98 {offsets = [0, 16], sizes = [16, 8], strides = [1, 1]} : vector<16x96xf32> to vector<16x8xf32>
    %136 = vector.extract_strided_slice %98 {offsets = [0, 48], sizes = [16, 8], strides = [1, 1]} : vector<16x96xf32> to vector<16x8xf32>
    %137 = vector.extract_strided_slice %98 {offsets = [0, 80], sizes = [16, 8], strides = [1, 1]} : vector<16x96xf32> to vector<16x8xf32>
    %cst_52 = arith.constant dense<0.000000e+00> : vector<16x16xf32>
    %138 = tpu.matmul %135, %136, %cst_52 {dimension_numbers = #tpu.dot_dimension_numbers<[1], [1], [0], [0], [0, 0, 1, 0], [], []>} : vector<16x8xf32>, vector<16x8xf32>, vector<16x16xf32> -> vector<16x16xf32>
    %cst_53 = arith.constant 0.353553385 : f32
    %139 = vector.broadcast %cst_53 : f32 to vector<16x16xf32>
    %140 = arith.mulf %138, %139 : vector<16x16xf32>
    %141 = arith.addf %140, %10 : vector<16x16xf32>
    %cst_54 = arith.constant dense<0xFF800000> : vector<16xf32>
    %142 = vector.multi_reduction <maximumf>, %141, %cst_54 [1] : vector<16x16xf32> to vector<16xf32>
    %143 = vector.shape_cast %142 : vector<16xf32> to vector<16x1xf32>
    %144 = vector.broadcast %143 : vector<16x1xf32> to vector<16x16xf32>
    %145 = arith.subf %141, %144 : vector<16x16xf32>
    %146 = math.exp %145 : vector<16x16xf32>
    %cst_55 = arith.constant dense<0.000000e+00> : vector<16xf32>
    %147 = vector.multi_reduction <add>, %146, %cst_55 [1] : vector<16x16xf32> to vector<16xf32>
    %148 = vector.shape_cast %147 : vector<16xf32> to vector<16x1xf32>
    %cst_56 = arith.constant dense<0.000000e+00> : vector<16x8xf32>
    %149 = tpu.matmul %146, %137, %cst_56 {dimension_numbers = #tpu.dot_dimension_numbers<[1], [0], [0], [1], [0, 0, 1, 1], [], []>} : vector<16x16xf32>, vector<16x8xf32>, vector<16x8xf32> -> vector<16x8xf32>
    %150 = tpu.reciprocal %148 {approx = true} : vector<16x1xf32> -> vector<16x1xf32>
    %151 = vector.broadcast %150 : vector<16x1xf32> to vector<16x8xf32>
    %152 = arith.mulf %149, %151 : vector<16x8xf32>
    %153 = vector.extract_strided_slice %98 {offsets = [0, 24], sizes = [16, 8], strides = [1, 1]} : vector<16x96xf32> to vector<16x8xf32>
    %154 = vector.extract_strided_slice %98 {offsets = [0, 56], sizes = [16, 8], strides = [1, 1]} : vector<16x96xf32> to vector<16x8xf32>
    %155 = vector.extract_strided_slice %98 {offsets = [0, 88], sizes = [16, 8], strides = [1, 1]} : vector<16x96xf32> to vector<16x8xf32>
    %cst_57 = arith.constant dense<0.000000e+00> : vector<16x16xf32>
    %156 = tpu.matmul %153, %154, %cst_57 {dimension_numbers = #tpu.dot_dimension_numbers<[1], [1], [0], [0], [0, 0, 1, 0], [], []>} : vector<16x8xf32>, vector<16x8xf32>, vector<16x16xf32> -> vector<16x16xf32>
    %cst_58 = arith.constant 0.353553385 : f32
    %157 = vector.broadcast %cst_58 : f32 to vector<16x16xf32>
    %158 = arith.mulf %156, %157 : vector<16x16xf32>
    %159 = arith.addf %158, %10 : vector<16x16xf32>
    %cst_59 = arith.constant dense<0xFF800000> : vector<16xf32>
    %160 = vector.multi_reduction <maximumf>, %159, %cst_59 [1] : vector<16x16xf32> to vector<16xf32>
    %161 = vector.shape_cast %160 : vector<16xf32> to vector<16x1xf32>
    %162 = vector.broadcast %161 : vector<16x1xf32> to vector<16x16xf32>
    %163 = arith.subf %159, %162 : vector<16x16xf32>
    %164 = math.exp %163 : vector<16x16xf32>
    %cst_60 = arith.constant dense<0.000000e+00> : vector<16xf32>
    %165 = vector.multi_reduction <add>, %164, %cst_60 [1] : vector<16x16xf32> to vector<16xf32>
    %166 = vector.shape_cast %165 : vector<16xf32> to vector<16x1xf32>
    %cst_61 = arith.constant dense<0.000000e+00> : vector<16x8xf32>
    %167 = tpu.matmul %164, %155, %cst_61 {dimension_numbers = #tpu.dot_dimension_numbers<[1], [0], [0], [1], [0, 0, 1, 1], [], []>} : vector<16x16xf32>, vector<16x8xf32>, vector<16x8xf32> -> vector<16x8xf32>
    %168 = tpu.reciprocal %166 {approx = true} : vector<16x1xf32> -> vector<16x1xf32>
    %169 = vector.broadcast %168 : vector<16x1xf32> to vector<16x8xf32>
    %170 = arith.mulf %167, %169 : vector<16x8xf32>
    %171 = tpu.concatenate %116, %134, %152, %170 in 1 : vector<16x8xf32>, vector<16x8xf32>, vector<16x8xf32>, vector<16x8xf32> -> vector<16x32xf32>
    %c0_62 = arith.constant 0 : index
    %c0_63 = arith.constant 0 : index
    %172 = vector.load %arg10[%c0_62, %c0_63] : memref<32x32xf32, #tpu.memory_space<vmem>>, vector<32x32xf32>
    %cst_64 = arith.constant dense<0.000000e+00> : vector<16x32xf32>
    %173 = tpu.matmul %171, %172, %cst_64 {dimension_numbers = #tpu.dot_dimension_numbers<[1], [0], [0], [1], [0, 0, 1, 1], [], []>} : vector<16x32xf32>, vector<32x32xf32>, vector<16x32xf32> -> vector<16x32xf32>
    %c0_65 = arith.constant 0 : index
    %c0_66 = arith.constant 0 : index
    %174 = vector.load %arg11[%c0_65, %c0_66] : memref<1x32xf32, #tpu.memory_space<vmem>>, vector<1x32xf32>
    %175 = vector.broadcast %174 : vector<1x32xf32> to vector<16x32xf32>
    %176 = arith.addf %173, %175 : vector<16x32xf32>
    %c0_67 = arith.constant 0 : index
    %c0_68 = arith.constant 0 : index
    %177 = vector.load %arg12[%c0_67, %c0_68] : memref<32x64xf32, #tpu.memory_space<vmem>>, vector<32x64xf32>
    %cst_69 = arith.constant dense<0.000000e+00> : vector<16x64xf32>
    %178 = tpu.matmul %176, %177, %cst_69 {dimension_numbers = #tpu.dot_dimension_numbers<[1], [0], [0], [1], [0, 0, 1, 1], [], []>} : vector<16x32xf32>, vector<32x64xf32>, vector<16x64xf32> -> vector<16x64xf32>
    %c0_70 = arith.constant 0 : index
    %c0_71 = arith.constant 0 : index
    %179 = vector.load %arg13[%c0_70, %c0_71] : memref<1x64xf32, #tpu.memory_space<vmem>>, vector<1x64xf32>
    %180 = vector.broadcast %179 : vector<1x64xf32> to vector<16x64xf32>
    %181 = arith.addf %178, %180 : vector<16x64xf32>
    %cst_72 = arith.constant 0.000000e+00 : f32
    %182 = vector.broadcast %cst_72 : f32 to vector<16x64xf32>
    %183 = arith.maximumf %181, %182 : vector<16x64xf32>
    %c0_73 = arith.constant 0 : index
    %c0_74 = arith.constant 0 : index
    %184 = vector.load %arg14[%c0_73, %c0_74] : memref<64x32xf32, #tpu.memory_space<vmem>>, vector<64x32xf32>
    %cst_75 = arith.constant dense<0.000000e+00> : vector<16x32xf32>
    %185 = tpu.matmul %183, %184, %cst_75 {dimension_numbers = #tpu.dot_dimension_numbers<[1], [0], [0], [1], [0, 0, 1, 1], [], []>} : vector<16x64xf32>, vector<64x32xf32>, vector<16x32xf32> -> vector<16x32xf32>
    %c0_76 = arith.constant 0 : index
    %c0_77 = arith.constant 0 : index
    %186 = vector.load %arg15[%c0_76, %c0_77] : memref<1x32xf32, #tpu.memory_space<vmem>>, vector<1x32xf32>
    %187 = vector.broadcast %186 : vector<1x32xf32> to vector<16x32xf32>
    %188 = arith.addf %185, %187 : vector<16x32xf32>
    %c0_78 = arith.constant 0 : index
    %c0_79 = arith.constant 0 : index
    %189 = vector.load %arg16[%c0_78, %c0_79] : memref<32x128xf32, #tpu.memory_space<vmem>>, vector<32x128xf32>
    %cst_80 = arith.constant dense<0.000000e+00> : vector<16x128xf32>
    %190 = tpu.matmul %188, %189, %cst_80 {dimension_numbers = #tpu.dot_dimension_numbers<[1], [0], [0], [1], [0, 0, 1, 1], [], []>} : vector<16x32xf32>, vector<32x128xf32>, vector<16x128xf32> -> vector<16x128xf32>
    %c0_81 = arith.constant 0 : index
    %c0_82 = arith.constant 0 : index
    %191 = vector.load %arg17[%c0_81, %c0_82] : memref<1x128xf32, #tpu.memory_space<vmem>>, vector<1x128xf32>
    %192 = vector.broadcast %191 : vector<1x128xf32> to vector<16x128xf32>
    %193 = arith.addf %190, %192 : vector<16x128xf32>
    %c0_83 = arith.constant 0 : index
    %c0_84 = arith.constant 0 : index
    %194 = vector.load %arg18[%c0_83, %c0_84] : memref<16x128xf32, #tpu.memory_space<vmem>>, vector<16x128xf32>
    tpu.vector_store %arg18[%c0_83, %c0_84], %193 {strides = array<i32>} : memref<16x128xf32, #tpu.memory_space<vmem>>, vector<16x128xf32>,
    return
  }
}

</mosaic_0001>

<bundles_post_ra>
// kernel: transformer_forward_pallas.1
= control target key start
LH: loop header
LB: loop body
LE: loop exit
PB: predicated region body
PF: predicated region fallthrough
CT: control target
= control target key end

     0   :  { %s3910_s0 = inlined_call_operand.vmem [shape: s32[16,1], index: 0, kind: input, shape index: {}]   ;;  %s3911_s1 = inlined_call_operand.hbm [shape: f32[16,32], index: 1, kind: input, shape index: {}]   ;;  %s3912_s2 = inlined_call_operand.vmem [shape: f32[16,32], index: 2, kind: input, shape index: {}]   ;;  %s3913_s3 = inlined_call_operand.vmem [shape: f32[16,16], index: 3, kind: input, shape index: {}]   ;;  %s3914_s4 = inlined_call_operand.vmem [shape: f32[32,96], index: 4, kind: input, shape index: {}]   ;;  %s3915_s5 = inlined_call_operand.vmem [shape: f32[1,96], index: 5, kind: input, shape index: {}]   ;;  %s3916_s6 = inlined_call_operand.vmem [shape: f32[32,32], index: 6, kind: input, shape index: {}]   ;;  %s3917_s7 = inlined_call_operand.vmem [shape: f32[1,32], index: 7, kind: input, shape index: {}]   ;;  %s3918_s8 = inlined_call_operand.vmem [shape: f32[32,96], index: 8, kind: input, shape index: {}]   ;;  %s3919_s9 = inlined_call_operand.vmem [shape: f32[1,96], index: 9, kind: input, shape index: {}]   ;;  %s3920_s10 = inlined_call_operand.vmem [shape: f32[32,32], index: 10, kind: input, shape index: {}]   ;;  %s3921_s11 = inlined_call_operand.vmem [shape: f32[1,32], index: 11, kind: input, shape index: {}]   ;;  %s3922_s12 = inlined_call_operand.hbm [shape: f32[32,64], index: 12, kind: input, shape index: {}]   ;;  %s3923_s13 = inlined_call_operand.vmem [shape: f32[1,64], index: 13, kind: input, shape index: {}]   ;;  %s3924_s14 = inlined_call_operand.vmem [shape: f32[64,32], index: 14, kind: input, shape index: {}]   ;;  %s3925_s15 = inlined_call_operand.vmem [shape: f32[1,32], index: 15, kind: input, shape index: {}]   ;;  %s3926_s16 = inlined_call_operand.hbm [shape: f32[32,128], index: 16, kind: input, shape index: {}]   ;;  %s3927_s17 = inlined_call_operand.vmem [shape: f32[1,128], index: 17, kind: input, shape index: {}]   ;;  %s3928_s18 = inlined_call_operand.vmem [shape: f32[16,128], index: 18, kind: output, shape index: {}]  }
   0x1   :  { %3934 = sst [smem:[#allocation9_spill]] %s3910_s0 }
   0x2   :  { %3935 = sst [smem:[#allocation10_spill]] %s3911_s1 }
   0x3   :  { %3936 = sst [smem:[#allocation11_spill]] %s3912_s2 }
   0x4   :  { %23 = vsyncpa [#allocation3], 0 }
   0x5   :  { %24 = vsyncpa [#allocation5], 0  ;;  %s3328_s27 = smov [#allocation4]   ;;  %s3329_s29 = smov [#allocation2]  }
   0x6   :  { %s64_s28 = sshll.u32 %s3328_s27, 4  ;;  %s32_s30 = sshll.u32 %s3329_s29, 4  ;;  %s65_s28 = int_to_ptr.vmem [resolvable:$true] %s64_s28  ;;  %s3443_s30 = int_to_ptr.vmem [resolvable:$true] %s32_s30 }
   0x7   :  { %s3258_s1 = scalar_lea.hbm %s3922_s12, 512 }
   0x8   :  { %p3259_p0 = scmp.ne.s32.totalorder %s3922_s12, %s3258_s1  ;;  %p3262_p1 = scmp.lt.u32.totalorder %s3258_s1, %s3922_s12 }
   0xa   :  { %p3264_p2 = pnand %p3262_p1, %p3259_p0 }
   0xc   :  { %3267 = shalt.err (!%p3264_p2)
}
   0xd   :  { %s3268_s23 = scalar_lea.vmem %s65_s28, 512  ;;  %p3273_p4 = scmp.lt.s32.totalorder %s65_s28, %s65_s28 }
   0xe   :  { %p3269_p3 = scmp.ne.s32.totalorder %s65_s28, %s3268_s23  ;;  %p3274_p5 = scmp.lt.s32.totalorder %s3268_s23, %s3268_s23 }
  0x10   :  { %p3275_p6 = por %p3274_p5, %p3273_p4 }
  0x12   :  { %p3276_p7 = pnand %p3275_p6, %p3269_p3 }
  0x14   :  { %3279 = shalt.err (!%p3276_p7)
}
  0x15   :  { %s3330_s24 = smov 128   ;;  %s3932_s25 = smov 8  }
  0x16   :  { %70 = dma.hbm_to_vmem [thread:$0]  %s3922_s12, 512, %s65_s28, [#allocation5], %s3330_s24, %s3330_s24, %s3932_s25  }
  0x17   :  { %s3937_s19 = sld [smem:[#allocation10_spill]] }
  0x1d   :  { %s3280_s1 = scalar_lea.hbm %s3937_s19, 256 }
  0x1e   :  { %p3281_p8 = scmp.ne.s32.totalorder %s3937_s19, %s3280_s1  ;;  %p3284_p9 = scmp.lt.u32.totalorder %s3280_s1, %s3937_s19 }
  0x20   :  { %p3286_p10 = pnand %p3284_p9, %p3281_p8 }
  0x22   :  { %3289 = shalt.err (!%p3286_p10)
}
  0x23   :  { %s3290_s23 = scalar_lea.vmem %s3443_s30, 256  ;;  %p3295_p12 = scmp.lt.s32.totalorder %s3443_s30, %s3443_s30 }
  0x24   :  { %p3291_p11 = scmp.ne.s32.totalorder %s3443_s30, %s3290_s23  ;;  %p3296_p13 = scmp.lt.s32.totalorder %s3290_s23, %s3290_s23 }
  0x26   :  { %p3297_p0 = por %p3296_p13, %p3295_p12 }
  0x28   :  { %p3298_p1 = pnand %p3297_p0, %p3291_p11 }
  0x2a   :  { %3301 = shalt.err (!%p3298_p1)
}
  0x2b   :  { %38 = dma.hbm_to_vmem [thread:$0]  %s3937_s19, 256, %s3443_s30, [#allocation3], %s3330_s24, %s3330_s24, %s3932_s25  }
  0x2c   :  { %s3332_s26 = smov [#allocation6]   ;;  %s3302_s1 = scalar_lea.hbm %s3926_s16, 512 }
  0x2d   :  { %s82_s27 = sshll.u32 %s3332_s26, 4  ;;  %p3303_p2 = scmp.ne.s32.totalorder %s3926_s16, %s3302_s1  ;;  %s83_s27 = int_to_ptr.vmem [resolvable:$true] %s82_s27 }
  0x2e   :  { %p3306_p3 = scmp.lt.u32.totalorder %s3302_s1, %s3926_s16 }
  0x30   :  { %p3308_p4 = pnand %p3306_p3, %p3303_p2 }
  0x32   :  { %3311 = shalt.err (!%p3308_p4)
}
  0x33   :  { %s3312_s23 = scalar_lea.vmem %s83_s27, 512  ;;  %p3317_p6 = scmp.lt.s32.totalorder %s83_s27, %s83_s27 }
  0x34   :  { %p3313_p5 = scmp.ne.s32.totalorder %s83_s27, %s3312_s23  ;;  %p3318_p7 = scmp.lt.s32.totalorder %s3312_s23, %s3312_s23 }
  0x36   :  { %p3319_p8 = por %p3318_p7, %p3317_p6 }
  0x38   :  { %p3320_p9 = pnand %p3319_p8, %p3313_p5 }
  0x3a   :  { %3323 = shalt.err (!%p3320_p9)
}
  0x3b   :  { %88 = dma.hbm_to_vmem [thread:$0]  %s3926_s16, 512, %s83_s27, [#allocation5], %s3330_s24, %s3330_s24, %s3932_s25  }
  0x3c   :  { %3324 = dma.done.wait [#allocation3], 256  }
  0x3d   :  { %3325 = vsyncadd [#allocation3], 4294967040 }
  0x3e   :  { %3326 = dma.done.wait [#allocation5], 1024  }
  0x3f   :  { %3327 = vsyncadd [#allocation5], 4294966272  ;;  %v3333_v0 = vmov 0   ;;  %s3938_s26 = sld [smem:[#allocation9_spill]]  ;;  %v116_v2 = vld [vmem:[#allocation2] sm:$0xff]  ;;  %v117_v3 = vld [vmem:[#allocation2 + $0x8] sm:$0xff]  ;;  %v102_v9 = vlaneseq }
  0x40   :  { %3113 = vset.pattern.permute.xlu0 %v3333_v0  ;;  %v2945_v5 = vpack.c.bf16 %v117_v3, %v116_v2  ;;  %v204_v6 = vld [vmem:[%s3914_s4] sm:$0xff]  ;;  %v205_v7 = vld [vmem:[%s3914_s4 + $0x8] sm:$0xff]  ;;  %vm120_vm0 = vcmask 130048   ;;  %v3334_v12 = vmov 0.0   ;;  %v206_v16 = vld [vmem:[%s3914_s4 + $0x10] sm:$0xff]  ;;  %s3939_s19 = sld [smem:[#allocation11_spill]] }
  0x41   :  { %v2949_v8 = vpack.c.bf16 %v205_v7, %v204_v6  ;;  %v103_v10 = vand.u32 127, %v102_v9  ;;  %v207_v17 = vld [vmem:[%s3914_s4 + $0x18] sm:$0xff]  ;;  %vm215_vm3 = vcmask 261120   ;;  %v2558_v25 = vld [vmem:[%s3915_s5] ss:$0 sm:$0xff]  ;;  %vm303_vm4 = vcmask 64512  }
  0x42   :  { %2946 = vmatprep.subr.bf16.mxu0 %v2945_v5  ;;  %v2953_v18 = vpack.c.bf16 %v207_v17, %v206_v16  ;;  %s3335_s29 = smov 120   ;;  %s3336_s0 = smov 96   ;;  %vm3548_vm5 = vmpackc.low %vm303_vm4, %vm303_vm4  ;;  %v3567_v47 = vld [vmem:[%s3913_s3 + $0x8] sm:$0xff]  ;;  %v3572_v50 = vld [vmem:[%s3913_s3] sm:$0xff]  ;;  %vm1140_vm6 = vcmask 195584   ;;  %vm2372_vm7 = vcmask 523264  }
  0x43   :  { %2948 = vmatpush3.bf16.msra.mxu0 %v2945_v5  ;;  %2950 = vmatprep.subr.bf16.mxu1 %v2949_v8  ;;  %s3337_s5 = smov 88   ;;  %s3338_s16 = smov 64  }
  0x44   :  { %2952 = vmatpush3.bf16.msra.mxu1 %v2949_v8  ;;  %s3339_s3 = smov 80   ;;  %s3340_s21 = smov 112  }
  0x45   :  { %v100_v1 = vld [vmem:[%s3938_s26] sm:$0xff]  ;;  %v101_v4 = vld [vmem:[%s3938_s26 + $0x8] sm:$0xff]  ;;  %2954 = vmatprep.subr.bf16.mxu1 %v2953_v18  ;;  %s3341_s22 = smov 72   ;;  %s3342_s2 = smov 56  }
  0x46   :  { %105 = vperm.xlu0 %3113, %v100_v1   ;;  %v118_v19 = vld [vmem:[%s3939_s19] sm:$0xff]  ;;  %v119_v20 = vld [vmem:[%s3939_s19 + $0x8] sm:$0xff]  ;;  %s3343_s23 = smov 104   ;;  %s3344_s30 = smov 48  }
  0x47   :  { %s3345_s19 = smov 40   ;;  %s3346_s12 = smov 16  }
  0x48   :  { %2956 = vmatpush3.bf16.msra.mxu1 %v2953_v18 }
  0x4a   :  { %108 = vperm.xlu0 %3113, %v101_v4  }
  0xc5   :  { %v106_v11 = vpop.permute.xlu0 %105 }
  0xc6   :  { %vm110_vm1 = vcmp.eq.s32.totalorder %v106_v11, %v103_v10 }
  0xc7   :  { %v2554_v13 = vsel %vm110_vm1, 1.0, %v3334_v12 }
  0xc8   :  { %2745 = vmatprep.mubr.msk.f32.mxu0 %vm120_vm0, %v2554_v13 }
  0xc9   :  { %v109_v14 = vpop.permute.xlu0 %108 }
  0xca   :  { %vm111_vm2 = vcmp.eq.s32.totalorder %v109_v14, %v103_v10 }
  0xcb   :  { %v2555_v15 = vsel %vm111_vm2, 1.0, %v3334_v12 }
  0xcc   :  { %2746 = vmatmul.mubr.msk.f32.vlgmr.msra.gmra.mrb[0].mxu0 %vm120_vm0, %v2555_v15 }
 0x19f   :  { %v2747_v21 = vpop.f32.mrb[0].mxu0 }
 0x1a0   :  { %v193_v22 = vpop.f32.mrb[1].mxu0  ;;  %v199_v24 = vadd.f32 %v2747_v21, %v119_v20 }
 0x1a1   :  { %v194_v23 = vadd.f32 %v193_v22, %v118_v19 }
 0x1a3   :  { %2756 = vmatprep.mubr.msk.f32.mxu1 %vm215_vm3, %v194_v23 }
 0x1a4   :  { %2757 = vmatmul.mubr.msk.f32.vlgmr.msra.gmra.mrb[0].mxu1 %vm215_vm3, %v199_v24 }
 0x277   :  { %v2758_v26 = vpop.f32.mrb[0].mxu1 }
 0x278   :  { %v3526_v27 = vadd.f32 %v2758_v26, %v2558_v25  ;;  %v288_v28 = vpop.f32.mrb[1].mxu1 }
 0x279   :  { %v3528_v29 = vadd.f32 %v2558_v25, %v288_v28 }
 0x27b   :  { %500 = vrot.lane.b32.xlu0 %v3528_v29, %s3335_s29  ;;  %2763 = vmatprep.mubr.msk.f32.mxu0 %vm303_vm4, %v3528_v29  ;;  %v3536_v30 = vpack.i.bf16 %v3526_v27, %v3528_v29 }
 0x27d   :  { %3115 = vrot.lane.b32.xlu1 %v3536_v30, %s3336_s0 }
 0x281   :  { %3120 = vrot.lane.b32.xlu1 %v3536_v30, %s3337_s5 }
 0x285   :  { %502 = vrot.lane.b32.xlu1 %v3526_v27, %s3335_s29 }
 0x289   :  { %3125 = vrot.lane.b32.xlu1 %v3536_v30, %s3338_s16 }
 0x2ed   :  { %v501_v42 = vpop.permute.xlu0 %500 }
 0x2ef   :  { %v3116_v31 = vpop.permute.xlu1 %3115 }
 0x2f0   :  { %v3118_v32 = vunpack.i.h.bf16 %v3116_v31  ;;  %v3117_v33 = vunpack.i.l.bf16 %v3116_v31 }
 0x2f2   :  { %v2957_v35 = vpack.c.bf16 %v3118_v32, %v3117_v33 }
 0x2f3   :  { %v3121_v36 = vpop.permute.xlu1 %3120 }
 0x2f4   :  { %v3123_v37 = vunpack.i.h.bf16 %v3121_v36  ;;  %v3122_v38 = vunpack.i.l.bf16 %v3121_v36  ;;  %2959 = vmatprep.subr.msk.bf16.mxu0 %vm3548_vm5, %v2957_v35 }
 0x2f5   :  { %2962 = vmatpush3.bf16.xpose.msk.msra.mxu0 %vm3548_vm5, %v2957_v35 }
 0x2f6   :  { %v2967_v39 = vpack.c.bf16 %v3123_v37, %v3122_v38 }
 0x2f7   :  { %v503_v40 = vpop.permute.xlu1 %502 }
 0x2f8   :  { %2969 = vmatprep.subr.msk.bf16.mxu0 %vm3548_vm5, %v2967_v39 }
 0x2fb   :  { %v3126_v41 = vpop.permute.xlu1 %3125 }
 0x2fc   :  { %v3128_v43 = vunpack.i.h.bf16 %v3126_v41  ;;  %v3127_v44 = vunpack.i.l.bf16 %v3126_v41  ;;  %2764 = vmatmul.mubr.msk.f32.vlgmr.msra.gmra.mrb[2].mxu0 %vm303_vm4, %v3526_v27 }
 0x2fd   :  { %2972 = vmatpush3.bf16.xpose.msk.msra.mxu0 %vm3548_vm5, %v2967_v39  ;;  %2777 = vmatprep.mubr.msk.f32.mxu0 %vm303_vm4, %v501_v42 }
 0x2fe   :  { %v2963_v45 = vpack.c.bf16 %v3128_v43, %v3127_v44 }
 0x300   :  { %2964 = vmatprep.subr.bf16.mxu1 %v2963_v45 }
 0x301   :  { %2966 = vmatpush3.bf16.msra.mxu1 %v2963_v45 }
 0x304   :  { %2778 = vmatmul.mubr.msk.f32.vlgmr.msra.gmra.mrb[4].mxu0 %vm303_vm4, %v503_v40 }
 0x3cf   :  { %v2765_v46 = vpop.f32.mrb[2].mxu0 }
 0x3d0   :  { %v388_v48 = vmul.f32 0.35355338, %v2765_v46  ;;  %v378_v49 = vpop.f32.mrb[3].mxu0 }
 0x3d1   :  { %v387_v51 = vmul.f32 0.35355338, %v378_v49 }
 0x3d2   :  { %v390_v52 = vadd.f32 %v388_v48, %v3567_v47 }
 0x3d3   :  { %v389_v53 = vadd.f32 %v387_v51, %v3572_v50 }
 0x3d4   :  { %v394_v54 = vsel %vm120_vm0, %v390_v52, -inf }
 0x3d5   :  { %395 = vmax.xlane.f32.xlu1 %v394_v54  ;;  %v391_v55 = vsel %vm120_vm0, %v389_v53, -inf }
 0x3d6   :  { %392 = vmax.xlane.f32.xlu0 %v391_v55 }
 0x3d7   :  { %v2779_v56 = vpop.f32.mrb[4].mxu0 }
 0x3d8   :  { %v592_v57 = vmul.f32 0.35355338, %v2779_v56  ;;  %v582_v58 = vpop.f32.mrb[5].mxu0 }
 0x3d9   :  { %v591_v59 = vmul.f32 0.35355338, %v582_v58 }
 0x3da   :  { %v594_v60 = vadd.f32 %v592_v57, %v3567_v47 }
 0x3db   :  { %v593_v62 = vadd.f32 %v591_v59, %v3572_v50 }
 0x3dc   :  { %v598_v61 = vsel %vm120_vm0, %v594_v60, -inf }
 0x3dd   :  { %599 = vmax.xlane.f32.xlu0 %v598_v61  ;;  %v595_v63 = vsel %vm120_vm0, %v593_v62, -inf }
 0x3e1   :  { %596 = vmax.xlane.f32.xlu0 %v595_v63 }
 0x3e6   :  { %3135 = vrot.lane.b32.xlu1 %v3536_v30, %s3339_s3 }
 0x3ea   :  { %704 = vrot.lane.b32.xlu1 %v3528_v29, %s3340_s21 }
 0x3ee   :  { %3145 = vrot.lane.b32.xlu1 %v3536_v30, %s3341_s22 }
 0x3f7   :  { %3130 = vrot.lane.b32.xlu0 %v3536_v30, %s3342_s2 }
 0x3fb   :  { %706 = vrot.lane.b32.xlu0 %v3526_v27, %s3340_s21 }
 0x462   :  { %v396_v0 = vpop.xlane.xlu1 %395 }
 0x463   :  { %v398_v1 = vsub.f32 %v390_v52, %v396_v0  ;;  %v393_v2 = vpop.xlane.xlu0 %392 }
 0x464   :  { %v397_v3 = vsub.f32 %v389_v53, %v393_v2 }
 0x465   :  { %v401_v4 = vmul.f32 1.442695, %v398_v1 }
 0x466   :  { %v399_v5 = vmul.f32 1.442695, %v397_v3  ;;  %v3136_v9 = vpop.permute.xlu1 %3135 }
 0x467   :  { %v3138_v14 = vunpack.i.h.bf16 %v3136_v9  ;;  %v3137_v17 = vunpack.i.l.bf16 %v3136_v9 }
 0x468   :  { %3194 = vpow2.f32 %v399_v5 }
 0x469   :  { %3196 = vpow2.f32 %v401_v4  ;;  %v2977_v21 = vpack.c.bf16 %v3138_v14, %v3137_v17 }
 0x46a   :  { %v600_v6 = vpop.xlane.xlu0 %599  ;;  %v705_v24 = vpop.permute.xlu1 %704 }
 0x46b   :  { %v602_v7 = vsub.f32 %v594_v60, %v600_v6 }
 0x46d   :  { %v605_v11 = vmul.f32 1.442695, %v602_v7 }
 0x46e   :  { %v597_v8 = vpop.xlane.xlu0 %596  ;;  %v3146_v42 = vpop.permute.xlu1 %3145 }
 0x46f   :  { %v601_v10 = vsub.f32 %v593_v62, %v597_v8  ;;  %v3148_v52 = vunpack.i.h.bf16 %v3146_v42  ;;  %v3147_v53 = vunpack.i.l.bf16 %v3146_v42 }
 0x471   :  { %v603_v12 = vmul.f32 1.442695, %v601_v10  ;;  %v2987_v56 = vpack.c.bf16 %v3148_v52, %v3147_v53  ;;  %v1235_v53 = vld [vmem:[%s3918_s8] sm:$0xff] }
 0x472   :  { %v3592_v13 = vpop.eup %3194  ;;  %v3131_v15 = vpop.permute.xlu0 %3130 }
 0x473   :  { %v3594_v16 = vpop.eup %3196  ;;  %3198 = vpow2.f32 %v603_v12  ;;  %v3133_v18 = vunpack.i.h.bf16 %v3131_v15  ;;  %v3132_v19 = vunpack.i.l.bf16 %v3131_v15  ;;  %2770 = vmatprep.mubr.msk.f32.mxu1 %vm120_vm0, %v3592_v13  ;;  %v403_v10 = vsel %vm120_vm0, %v3592_v13, 0.0 }
 0x474   :  { %3200 = vpow2.f32 %v605_v11  ;;  %2771 = vmatmul.mubr.msk.f32.vlgmr.msra.gmra.mrb[2].mxu1 %vm120_vm0, %v3594_v16 }
 0x475   :  { %v2973_v20 = vpack.c.bf16 %v3133_v18, %v3132_v19 }
 0x476   :  { %v707_v25 = vpop.permute.xlu0 %706 }
 0x477   :  { %2974 = vmatprep.subr.bf16.mxu1 %v2973_v20 }
 0x478   :  { %2976 = vmatpush3.bf16.msra.mxu1 %v2973_v20 }
 0x479   :  { %2979 = vmatprep.subr.msk.bf16.mxu1 %vm3548_vm5, %v2977_v21 }
 0x47d   :  { %v3602_v22 = vpop.eup %3198 }
 0x47e   :  { %v3604_v23 = vpop.eup %3200  ;;  %2784 = vmatprep.mubr.msk.f32.mxu1 %vm120_vm0, %v3602_v22  ;;  %v607_v6 = vsel %vm120_vm0, %v3602_v22, 0.0 }
 0x47f   :  { %2785 = vmatmul.mubr.msk.f32.vlgmr.msra.gmra.mrb[4].mxu1 %vm120_vm0, %v3604_v23  ;;  %v610_v7 = vsel %vm120_vm0, %v3604_v23, 0.0 }
 0x480   :  { %2791 = vmatprep.mubr.msk.f32.mxu1 %vm303_vm4, %v705_v24 }
 0x481   :  { %2982 = vmatpush3.bf16.xpose.msk.msra.mxu1 %vm3548_vm5, %v2977_v21 }
 0x488   :  { %2792 = vmatmul.mubr.msk.f32.vlgmr.msra.gmra.mrb[6].mxu1 %vm303_vm4, %v707_v25 }
 0x547   :  { %v3614_v26 = vpop.f32.mrb[2].mxu1 }
 0x548   :  { %v3616_v28 = vpop.f32.mrb[3].mxu1 }
 0x552   :  { %v3618_v31 = vpop.f32.mrb[4].mxu1 }
 0x553   :  { %v3620_v32 = vpop.f32.mrb[5].mxu1 }
 0x55b   :  { %v2793_v33 = vpop.f32.mrb[6].mxu1 }
 0x55c   :  { %v796_v35 = vmul.f32 0.35355338, %v2793_v33  ;;  %v786_v36 = vpop.f32.mrb[7].mxu1 }
 0x55d   :  { %v795_v37 = vmul.f32 0.35355338, %v786_v36 }
 0x55e   :  { %v798_v38 = vadd.f32 %v796_v35, %v3567_v47 }
 0x55f   :  { %v797_v39 = vadd.f32 %v795_v37, %v3572_v50  ;;  %v406_v37 = vsel %vm120_vm0, %v3594_v16, 0.0 }
 0x560   :  { %v802_v40 = vsel %vm120_vm0, %v798_v38, -inf }
 0x561   :  { %803 = vmax.xlane.f32.xlu0 %v802_v40  ;;  %v799_v41 = vsel %vm120_vm0, %v797_v39, -inf }
 0x562   :  { %800 = vmax.xlane.f32.xlu1 %v799_v41 }
 0x573   :  { %908 = vrot.lane.b32.xlu1 %v3528_v29, %s3343_s23 }
 0x577   :  { %3140 = vrot.lane.b32.xlu0 %v3536_v30, %s3344_s30 }
 0x57b   :  { %910 = vrot.lane.b32.xlu0 %v3526_v27, %s3343_s23 }
 0x5ee   :  { %v804_v43 = vpop.xlane.xlu0 %803 }
 0x5ef   :  { %v806_v44 = vsub.f32 %v798_v38, %v804_v43  ;;  %v801_v45 = vpop.xlane.xlu1 %800 }
 0x5f0   :  { %v805_v46 = vsub.f32 %v797_v39, %v801_v45  ;;  %v1143_v45 = vld [vmem:[%s3916_s6] sm:$0xff] }
 0x5f1   :  { %v809_v48 = vmul.f32 1.442695, %v806_v44 }
 0x5f2   :  { %v807_v49 = vmul.f32 1.442695, %v805_v46  ;;  %v3141_v51 = vpop.permute.xlu0 %3140 }
 0x5f3   :  { %v3143_v54 = vunpack.i.h.bf16 %v3141_v51  ;;  %v3142_v55 = vunpack.i.l.bf16 %v3141_v51  ;;  %v909_v58 = vpop.permute.xlu1 %908 }
 0x5f4   :  { %3202 = vpow2.f32 %v807_v49  ;;  %v1146_v49 = vld [vmem:[%s3916_s6 + $0x18] sm:$0xff] }
 0x5f5   :  { %3204 = vpow2.f32 %v809_v48  ;;  %v2983_v29 = vpack.c.bf16 %v3143_v54, %v3142_v55  ;;  %v1236_v54 = vld [vmem:[%s3918_s8 + $0x8] sm:$0xff] }
 0x5f6   :  { %v911_v59 = vpop.permute.xlu0 %910  ;;  %v3005_v55 = vpack.c.bf16 %v1236_v54, %v1235_v53 }
 0x5f7   :  { %2984 = vmatprep.subr.bf16.mxu0 %v2983_v29 }
 0x5f8   :  { %2986 = vmatpush3.bf16.msra.mxu0 %v2983_v29 }
 0x5f9   :  { %2989 = vmatprep.subr.msk.bf16.mxu0 %vm3548_vm5, %v2987_v56 }
 0x5fe   :  { %v3203_v27 = vpop.eup %3202 }
 0x5ff   :  { %v3205_v57 = vpop.eup %3204  ;;  %2798 = vmatprep.mubr.msk.f32.mxu0 %vm120_vm0, %v3203_v27  ;;  %v811_v8 = vsel %vm120_vm0, %v3203_v27, 0.0 }
 0x600   :  { %2799 = vmatmul.mubr.msk.f32.vlgmr.msra.gmra.mrb[6].mxu0 %vm120_vm0, %v3205_v57  ;;  %v814_v9 = vsel %vm120_vm0, %v3205_v57, 0.0 }
 0x601   :  { %2992 = vmatpush3.bf16.xpose.msk.msra.mxu0 %vm3548_vm5, %v2987_v56  ;;  %2805 = vmatprep.mubr.msk.f32.mxu0 %vm303_vm4, %v909_v58 }
 0x602   :  { %3006 = vmatprep.subr.bf16.mxu0 %v3005_v55 }
 0x608   :  { %2806 = vmatmul.mubr.msk.f32.vlgmr.msra.gmra.mrb[8].mxu0 %vm303_vm4, %v911_v59 }
 0x609   :  { %3008 = vmatpush3.bf16.msra.mxu0 %v3005_v55 }
 0x6d3   :  { %v2800_v60 = vpop.f32.mrb[6].mxu0 }
 0x6d4   :  { %v3640_v61 = vpop.f32.mrb[7].mxu0 }
 0x6db   :  { %v2807_v62 = vpop.f32.mrb[8].mxu0 }
 0x6dc   :  { %v1000_v63 = vmul.f32 0.35355338, %v2807_v62  ;;  %v990_v0 = vpop.f32.mrb[9].mxu0 }
 0x6dd   :  { %v999_v1 = vmul.f32 0.35355338, %v990_v0 }
 0x6de   :  { %v1002_v2 = vadd.f32 %v1000_v63, %v3567_v47 }
 0x6df   :  { %v1001_v3 = vadd.f32 %v999_v1, %v3572_v50 }
 0x6e0   :  { %v1006_v4 = vsel %vm120_vm0, %v1002_v2, -inf }
 0x6e1   :  { %1007 = vmax.xlane.f32.xlu0 %v1006_v4  ;;  %v1003_v5 = vsel %vm120_vm0, %v1001_v3, -inf }
 0x6e2   :  { %1004 = vmax.xlane.f32.xlu1 %v1003_v5 }
 0x6e6   :  { %608 = vadd.xlane.f32.xlu1 %v607_v6 }
 0x6ea   :  { %611 = vadd.xlane.f32.xlu1 %v610_v7 }
 0x6ee   :  { %812 = vadd.xlane.f32.xlu1 %v811_v8 }
 0x6f2   :  { %815 = vadd.xlane.f32.xlu1 %v814_v9 }
 0x6f7   :  { %3150 = vrot.lane.b32.xlu0 %v3536_v30, %s3345_s19 }
 0x716   :  { %404 = vadd.xlane.f32.xlu0 %v403_v10 }
 0x76e   :  { %v1008_v11 = vpop.xlane.xlu0 %1007 }
 0x76f   :  { %v1010_v12 = vsub.f32 %v1002_v2, %v1008_v11  ;;  %v1005_v14 = vpop.xlane.xlu1 %1004 }
 0x770   :  { %v1009_v15 = vsub.f32 %v1001_v3, %v1005_v14  ;;  %v1238_v14 = vld [vmem:[%s3918_s8 + $0x18] sm:$0xff] }
 0x771   :  { %v1013_v17 = vmul.f32 1.442695, %v1010_v12 }
 0x772   :  { %v1011_v18 = vmul.f32 1.442695, %v1009_v15  ;;  %v3151_v19 = vpop.permute.xlu0 %3150 }
 0x773   :  { %v3153_v20 = vunpack.i.h.bf16 %v3151_v19  ;;  %v3152_v21 = vunpack.i.l.bf16 %v3151_v19  ;;  %v609_v22 = vpop.xlane.xlu1 %608 }
 0x774   :  { %3206 = vpow2.f32 %v1011_v18 }
 0x775   :  { %3208 = vpow2.f32 %v1013_v17  ;;  %v2993_v23 = vpack.c.bf16 %v3153_v20, %v3152_v21  ;;  %v2585_v17 = vld [vmem:[%s3917_s7] ss:$0 sm:$0xff]  ;;  %s3942_s7 = smov 8  }
 0x777   :  { %2994 = vmatprep.subr.bf16.mxu1 %v2993_v23  ;;  %v612_v24 = vpop.xlane.xlu1 %611 }
 0x778   :  { %2996 = vmatpush3.bf16.msra.mxu1 %v2993_v23 }
 0x77b   :  { %v813_v30 = vpop.xlane.xlu1 %812 }
 0x77e   :  { %v3207_v25 = vpop.eup %3206 }
 0x77f   :  { %v3209_v13 = vpop.eup %3208  ;;  %2812 = vmatprep.mubr.msk.f32.mxu1 %vm120_vm0, %v3207_v25  ;;  %v816_v33 = vpop.xlane.xlu1 %815  ;;  %v1015_v35 = vsel %vm120_vm0, %v3207_v25, 0.0 }
 0x780   :  { %3210 = vrcp.f32 %v816_v33  ;;  %2813 = vmatmul.mubr.msk.f32.vlgmr.msra.gmra.mrb[8].mxu1 %vm120_vm0, %v3209_v13  ;;  %1016 = vadd.xlane.f32.xlu1 %v1015_v35  ;;  %v1018_v36 = vsel %vm120_vm0, %v3209_v13, 0.0 }
 0x781   :  { %3212 = vrcp.f32 %v609_v22  ;;  %v2588_v22 = vld [vmem:[%s3919_s9] ss:$0 sm:$0xff] }
 0x782   :  { %3214 = vrcp.f32 %v612_v24 }
 0x783   :  { %3216 = vrcp.f32 %v813_v30 }
 0x784   :  { %1019 = vadd.xlane.f32.xlu1 %v1018_v36 }
 0x788   :  { %407 = vadd.xlane.f32.xlu1 %v406_v37 }
 0x78a   :  { %v3211_v38 = vpop.eup %3210 }
 0x78b   :  { %v907_v39 = vmul.f32 %v3211_v38, %v2800_v60  ;;  %v3213_v40 = vpop.eup %3212 }
 0x78c   :  { %v702_v41 = vmul.f32 %v3213_v40, %v3620_v32  ;;  %v3215_v42 = vpop.eup %3214  ;;  %v1144_v32 = vld [vmem:[%s3916_s6 + $0x8] sm:$0xff] }
 0x78d   :  { %1124 = vrot.lane.b32.xlu0 %v907_v39, %s3346_s12  ;;  %v703_v43 = vmul.f32 %v3215_v42, %v3618_v31  ;;  %v3217_v44 = vpop.eup %3216  ;;  %v2997_v46 = vpack.c.bf16 %v1144_v32, %v1143_v45  ;;  %v1145_v31 = vld [vmem:[%s3916_s6 + $0x10] sm:$0xff]  ;;  %s3347_s6 = smov 24  }
 0x78e   :  { %v906_v16 = vmul.f32 %v3217_v44, %v3640_v61  ;;  %v3001_v52 = vpack.c.bf16 %v1146_v49, %v1145_v31 }
 0x78f   :  { %2998 = vmatprep.subr.bf16.mxu1 %v2997_v46 }
 0x790   :  { %3000 = vmatpush3.bf16.msra.mxu1 %v2997_v46 }
 0x791   :  { %3002 = vmatprep.subr.bf16.mxu1 %v3001_v52 }
 0x794   :  { %3004 = vmatpush3.bf16.msra.mxu1 %v3001_v52 }
 0x799   :  { %1114 = vrot.lane.b32.xlu1 %v702_v41, %s3932_s25 }
 0x79d   :  { %1116 = vrot.lane.b32.xlu1 %v703_v43, %s3932_s25 }
 0x7a1   :  { %1122 = vrot.lane.b32.xlu1 %v906_v16, %s3346_s12 }
 0x7a3   :  { %v405_v61 = vpop.xlane.xlu0 %404 }
 0x7ff   :  { %v1125_v10 = vpop.permute.xlu0 %1124 }
 0x80d   :  { %v1017_v48 = vpop.xlane.xlu1 %1016 }
 0x80e   :  { %3218 = vrcp.f32 %v1017_v48 }
 0x811   :  { %v1020_v51 = vpop.xlane.xlu1 %1019 }
 0x812   :  { %3220 = vrcp.f32 %v1020_v51 }
 0x813   :  { %3222 = vrcp.f32 %v405_v61 }
 0x815   :  { %v408_v60 = vpop.xlane.xlu1 %407 }
 0x816   :  { %3224 = vrcp.f32 %v408_v60 }
 0x818   :  { %v3219_v56 = vpop.eup %3218 }
 0x819   :  { %v1115_v62 = vpop.permute.xlu1 %1114 }
 0x81c   :  { %v3221_v58 = vpop.eup %3220 }
 0x81d   :  { %v1117_v63 = vpop.permute.xlu1 %1116  ;;  %v3223_v0 = vpop.eup %3222 }
 0x81e   :  { %v498_v3 = vmul.f32 %v3223_v0, %v3616_v28 }
 0x820   :  { %v3225_v1 = vpop.eup %3224  ;;  %v1136_v5 = vsel %vm303_vm4, %v498_v3, %v1115_v62 }
 0x821   :  { %v1123_v2 = vpop.permute.xlu1 %1122  ;;  %v499_v4 = vmul.f32 %v3225_v1, %v3614_v26  ;;  %v1237_v26 = vld [vmem:[%s3918_s8 + $0x10] sm:$0xff] }
 0x822   :  { %v1138_v6 = vsel %vm120_vm0, %v1136_v5, %v1123_v2  ;;  %v3009_v15 = vpack.c.bf16 %v1238_v14, %v1237_v26 }
 0x823   :  { %v1137_v8 = vsel %vm303_vm4, %v499_v4, %v1117_v63 }
 0x824   :  { %v1139_v11 = vsel %vm120_vm0, %v1137_v8, %v1125_v10  ;;  %3010 = vmatprep.subr.bf16.mxu0 %v3009_v15 }
 0x825   :  { %3012 = vmatpush3.bf16.msra.mxu0 %v3009_v15 }
 0x853   :  { %v2814_v29 = vpop.f32.mrb[8].mxu1 }
 0x854   :  { %v1099_v27 = vpop.f32.mrb[9].mxu1  ;;  %v1111_v59 = vmul.f32 %v3221_v58, %v2814_v29 }
 0x855   :  { %v1110_v57 = vmul.f32 %v3219_v56, %v1099_v27 }
 0x857   :  { %1130 = vrot.lane.b32.xlu1 %v1110_v57, %s3347_s6 }
 0x85b   :  { %1132 = vrot.lane.b32.xlu1 %v1111_v59, %s3347_s6 }
 0x8c9   :  { %v1131_v7 = vpop.permute.xlu1 %1130 }
 0x8ca   :  { %v1141_v9 = vsel %vm1140_vm6, %v1138_v6, %v1131_v7 }
 0x8cb   :  { %2823 = vmatprep.mubr.msk.f32.mxu1 %vm215_vm3, %v1141_v9 }
 0x8cd   :  { %v1133_v12 = vpop.permute.xlu1 %1132 }
 0x8ce   :  { %v1142_v28 = vsel %vm1140_vm6, %v1139_v11, %v1133_v12 }
 0x8cf   :  { %2824 = vmatmul.mubr.msk.f32.vlgmr.msra.gmra.mrb[10].mxu1 %vm215_vm3, %v1142_v28 }
 0x9a2   :  { %v2825_v18 = vpop.f32.mrb[10].mxu1 }
 0x9a3   :  { %v1226_v19 = vpop.f32.mrb[11].mxu1  ;;  %v1232_v21 = vadd.f32 %v2825_v18, %v2585_v17 }
 0x9a4   :  { %v1227_v20 = vadd.f32 %v2585_v17, %v1226_v19 }
 0x9a6   :  { %2834 = vmatprep.mubr.msk.f32.mxu0 %vm215_vm3, %v1227_v20 }
 0x9a7   :  { %2835 = vmatmul.mubr.msk.f32.vlgmr.msra.gmra.mrb[10].mxu0 %vm215_vm3, %v1232_v21 }
 0xa7a   :  { %v2836_v23 = vpop.f32.mrb[10].mxu0 }
 0xa7b   :  { %v3713_v24 = vadd.f32 %v2836_v23, %v2588_v22  ;;  %v1318_v30 = vpop.f32.mrb[11].mxu0 }
 0xa7c   :  { %v3715_v25 = vadd.f32 %v2588_v22, %v1318_v30 }
 0xa7e   :  { %2841 = vmatprep.mubr.msk.f32.mxu1 %vm303_vm4, %v3715_v25  ;;  %v3721_v13 = vpack.i.bf16 %v3713_v24, %v3715_v25 }
 0xa80   :  { %3155 = vrot.lane.b32.xlu1 %v3721_v13, %s3336_s0 }
 0xa84   :  { %3160 = vrot.lane.b32.xlu1 %v3721_v13, %s3338_s16 }
 0xaf2   :  { %v3156_v33 = vpop.permute.xlu1 %3155 }
 0xaf3   :  { %v3158_v35 = vunpack.i.h.bf16 %v3156_v33  ;;  %v3157_v36 = vunpack.i.l.bf16 %v3156_v33 }
 0xaf5   :  { %v3013_v37 = vpack.c.bf16 %v3158_v35, %v3157_v36 }
 0xaf6   :  { %v3161_v38 = vpop.permute.xlu1 %3160 }
 0xaf7   :  { %v3163_v39 = vunpack.i.h.bf16 %v3161_v38  ;;  %v3162_v40 = vunpack.i.l.bf16 %v3161_v38  ;;  %3015 = vmatprep.subr.msk.bf16.mxu1 %vm3548_vm5, %v3013_v37 }
 0xaf8   :  { %3018 = vmatpush3.bf16.xpose.msk.msra.mxu1 %vm3548_vm5, %v3013_v37 }
 0xaf9   :  { %v3019_v41 = vpack.c.bf16 %v3163_v39, %v3162_v40 }
 0xafb   :  { %3020 = vmatprep.subr.bf16.mxu0 %v3019_v41 }
 0xafc   :  { %3022 = vmatpush3.bf16.msra.mxu0 %v3019_v41 }
 0xaff   :  { %2842 = vmatmul.mubr.msk.f32.vlgmr.msra.gmra.mrb[12].mxu1 %vm303_vm4, %v3713_v24 }
 0xbd2   :  { %v2843_v42 = vpop.f32.mrb[12].mxu1 }
 0xbd3   :  { %v1417_v43 = vmul.f32 0.35355338, %v2843_v42  ;;  %v1407_v44 = vpop.f32.mrb[13].mxu1 }
 0xbd4   :  { %v1416_v16 = vmul.f32 0.35355338, %v1407_v44 }
 0xbd5   :  { %v1419_v45 = vadd.f32 %v1417_v43, %v3567_v47 }
 0xbd6   :  { %v1418_v32 = vadd.f32 %v1416_v16, %v3572_v50 }
 0xbd7   :  { %v1423_v46 = vsel %vm120_vm0, %v1419_v45, -inf }
 0xbd8   :  { %1424 = vmax.xlane.f32.xlu0 %v1423_v46  ;;  %v1420_v48 = vsel %vm120_vm0, %v1418_v32, -inf }
 0xbd9   :  { %1421 = vmax.xlane.f32.xlu1 %v1420_v48 }
 0xbea   :  { %1529 = vrot.lane.b32.xlu1 %v3715_v25, %s3335_s29 }
 0xbee   :  { %3165 = vrot.lane.b32.xlu0 %v3721_v13, %s3337_s5  ;;  %1531 = vrot.lane.b32.xlu1 %v3713_v24, %s3335_s29 }
 0xbf2   :  { %3175 = vrot.lane.b32.xlu1 %v3721_v13, %s3339_s3 }
 0xc65   :  { %v1425_v31 = vpop.xlane.xlu0 %1424 }
 0xc66   :  { %v1427_v49 = vsub.f32 %v1419_v45, %v1425_v31  ;;  %v1422_v51 = vpop.xlane.xlu1 %1421 }
 0xc67   :  { %v1426_v52 = vsub.f32 %v1418_v32, %v1422_v51 }
 0xc68   :  { %v1430_v53 = vmul.f32 1.442695, %v1427_v49 }
 0xc69   :  { %v1428_v54 = vmul.f32 1.442695, %v1426_v52  ;;  %v3166_v55 = vpop.permute.xlu0 %3165 }
 0xc6a   :  { %v3168_v29 = vunpack.i.h.bf16 %v3166_v55  ;;  %v3167_v56 = vunpack.i.l.bf16 %v3166_v55  ;;  %v1530_v59 = vpop.permute.xlu1 %1529 }
 0xc6b   :  { %3226 = vpow2.f32 %v1428_v54 }
 0xc6c   :  { %3228 = vpow2.f32 %v1430_v53  ;;  %v3023_v27 = vpack.c.bf16 %v3168_v29, %v3167_v56 }
 0xc6e   :  { %3025 = vmatprep.subr.msk.bf16.mxu0 %vm3548_vm5, %v3023_v27  ;;  %v1532_v60 = vpop.permute.xlu1 %1531 }
 0xc72   :  { %v3176_v7 = vpop.permute.xlu1 %3175 }
 0xc73   :  { %v3178_v14 = vunpack.i.h.bf16 %v3176_v7  ;;  %v3177_v15 = vunpack.i.l.bf16 %v3176_v7 }
 0xc75   :  { %v3747_v57 = vpop.eup %3226  ;;  %v3033_v20 = vpack.c.bf16 %v3178_v14, %v3177_v15 }
 0xc76   :  { %v3749_v58 = vpop.eup %3228  ;;  %2848 = vmatprep.mubr.msk.f32.mxu0 %vm120_vm0, %v3747_v57 }
 0xc77   :  { %2849 = vmatmul.mubr.msk.f32.vlgmr.msra.gmra.mrb[12].mxu0 %vm120_vm0, %v3749_v58 }
 0xc78   :  { %3028 = vmatpush3.bf16.xpose.msk.msra.mxu0 %vm3548_vm5, %v3023_v27  ;;  %2855 = vmatprep.mubr.msk.f32.mxu0 %vm303_vm4, %v1530_v59 }
 0xc7f   :  { %2856 = vmatmul.mubr.msk.f32.vlgmr.msra.gmra.mrb[14].mxu0 %vm303_vm4, %v1532_v60 }
 0xd4a   :  { %v3759_v61 = vpop.f32.mrb[12].mxu0 }
 0xd4b   :  { %v3761_v62 = vpop.f32.mrb[13].mxu0 }
 0xd52   :  { %v2857_v63 = vpop.f32.mrb[14].mxu0 }
 0xd53   :  { %v1621_v0 = vmul.f32 0.35355338, %v2857_v63  ;;  %v1611_v1 = vpop.f32.mrb[15].mxu0 }
 0xd54   :  { %v1620_v2 = vmul.f32 0.35355338, %v1611_v1 }
 0xd55   :  { %v1623_v3 = vadd.f32 %v1621_v0, %v3567_v47 }
 0xd56   :  { %v1622_v4 = vadd.f32 %v1620_v2, %v3572_v50 }
 0xd57   :  { %v1627_v5 = vsel %vm120_vm0, %v1623_v3, -inf }
 0xd58   :  { %1628 = vmax.xlane.f32.xlu0 %v1627_v5  ;;  %v1624_v6 = vsel %vm120_vm0, %v1622_v4, -inf }
 0xd59   :  { %1625 = vmax.xlane.f32.xlu1 %v1624_v6 }
 0xd6a   :  { %1733 = vrot.lane.b32.xlu1 %v3715_v25, %s3340_s21 }
 0xd6e   :  { %3170 = vrot.lane.b32.xlu0 %v3721_v13, %s3342_s2  ;;  %3185 = vrot.lane.b32.xlu1 %v3721_v13, %s3341_s22 }
 0xd72   :  { %1735 = vrot.lane.b32.xlu0 %v3713_v24, %s3340_s21 }
 0xde5   :  { %v1629_v8 = vpop.xlane.xlu0 %1628 }
 0xde6   :  { %v1631_v9 = vsub.f32 %v1623_v3, %v1629_v8  ;;  %v1626_v10 = vpop.xlane.xlu1 %1625 }
 0xde7   :  { %v1630_v11 = vsub.f32 %v1622_v4, %v1626_v10 }
 0xde8   :  { %v1634_v12 = vmul.f32 1.442695, %v1631_v9 }
 0xde9   :  { %v1632_v28 = vmul.f32 1.442695, %v1630_v11  ;;  %v3171_v26 = vpop.permute.xlu0 %3170 }
 0xdea   :  { %v3173_v17 = vunpack.i.h.bf16 %v3171_v26  ;;  %v3172_v18 = vunpack.i.l.bf16 %v3171_v26  ;;  %v1734_v23 = vpop.permute.xlu1 %1733 }
 0xdeb   :  { %3230 = vpow2.f32 %v1632_v28 }
 0xdec   :  { %3232 = vpow2.f32 %v1634_v12  ;;  %v3029_v19 = vpack.c.bf16 %v3173_v17, %v3172_v18 }
 0xded   :  { %v1736_v30 = vpop.permute.xlu0 %1735 }
 0xdee   :  { %3030 = vmatprep.subr.bf16.mxu1 %v3029_v19  ;;  %v3186_v44 = vpop.permute.xlu1 %3185 }
 0xdef   :  { %3032 = vmatpush3.bf16.msra.mxu1 %v3029_v19  ;;  %v3188_v51 = vunpack.i.h.bf16 %v3186_v44  ;;  %v3187_v52 = vunpack.i.l.bf16 %v3186_v44  ;;  %v2171_v44 = vld [vmem:[%s3920_s10] sm:$0xff] }
 0xdf0   :  { %3035 = vmatprep.subr.msk.bf16.mxu1 %vm3548_vm5, %v3033_v20 }
 0xdf1   :  { %v3043_v55 = vpack.c.bf16 %v3188_v51, %v3187_v52 }
 0xdf5   :  { %v3777_v21 = vpop.eup %3230 }
 0xdf6   :  { %v3779_v22 = vpop.eup %3232  ;;  %2862 = vmatprep.mubr.msk.f32.mxu1 %vm120_vm0, %v3777_v21  ;;  %v1636_v6 = vsel %vm120_vm0, %v3777_v21, 0.0 }
 0xdf7   :  { %2863 = vmatmul.mubr.msk.f32.vlgmr.msra.gmra.mrb[14].mxu1 %vm120_vm0, %v3779_v22  ;;  %v1639_v7 = vsel %vm120_vm0, %v3779_v22, 0.0 }
 0xdf8   :  { %3038 = vmatpush3.bf16.xpose.msk.msra.mxu1 %vm3548_vm5, %v3033_v20  ;;  %2869 = vmatprep.mubr.msk.f32.mxu1 %vm303_vm4, %v1734_v23 }
 0xdff   :  { %2870 = vmatmul.mubr.msk.f32.vlgmr.msra.gmra.mrb[16].mxu1 %vm303_vm4, %v1736_v30  ;;  %v1432_v30 = vsel %vm120_vm0, %v3747_v57, 0.0 }
 0xeca   :  { %v3789_v33 = vpop.f32.mrb[14].mxu1 }
 0xecb   :  { %v3791_v35 = vpop.f32.mrb[15].mxu1 }
 0xed2   :  { %v2871_v36 = vpop.f32.mrb[16].mxu1 }
 0xed3   :  { %v1825_v37 = vmul.f32 0.35355338, %v2871_v36  ;;  %v1815_v38 = vpop.f32.mrb[17].mxu1  ;;  %v1435_v36 = vsel %vm120_vm0, %v3749_v58, 0.0 }
 0xed4   :  { %v1824_v39 = vmul.f32 0.35355338, %v1815_v38 }
 0xed5   :  { %v1827_v40 = vadd.f32 %v1825_v37, %v3567_v47 }
 0xed6   :  { %v1826_v41 = vadd.f32 %v1824_v39, %v3572_v50 }
 0xed7   :  { %v1831_v42 = vsel %vm120_vm0, %v1827_v40, -inf }
 0xed8   :  { %1832 = vmax.xlane.f32.xlu0 %v1831_v42  ;;  %v1828_v43 = vsel %vm120_vm0, %v1826_v41, -inf }
 0xed9   :  { %1829 = vmax.xlane.f32.xlu1 %v1828_v43 }
 0xeea   :  { %1937 = vrot.lane.b32.xlu1 %v3715_v25, %s3343_s23 }
 0xeee   :  { %3180 = vrot.lane.b32.xlu0 %v3721_v13, %s3344_s30 }
 0xef2   :  { %1939 = vrot.lane.b32.xlu0 %v3713_v24, %s3343_s23 }
 0xf65   :  { %v1833_v16 = vpop.xlane.xlu0 %1832 }
 0xf66   :  { %v1835_v45 = vsub.f32 %v1827_v40, %v1833_v16  ;;  %v1830_v32 = vpop.xlane.xlu1 %1829 }
 0xf67   :  { %v1834_v46 = vsub.f32 %v1826_v41, %v1830_v32  ;;  %v2174_v32 = vld [vmem:[%s3920_s10 + $0x18] sm:$0xff] }
 0xf68   :  { %v1838_v48 = vmul.f32 1.442695, %v1835_v45 }
 0xf69   :  { %v1836_v31 = vmul.f32 1.442695, %v1834_v46  ;;  %v3181_v49 = vpop.permute.xlu0 %3180 }
 0xf6a   :  { %v3183_v53 = vunpack.i.h.bf16 %v3181_v49  ;;  %v3182_v54 = vunpack.i.l.bf16 %v3181_v49  ;;  %v1938_v56 = vpop.permute.xlu1 %1937  ;;  %v2264_v49 = vld [vmem:[#allocation4 + $0x8] sm:$0xff] }
 0xf6b   :  { %3234 = vpow2.f32 %v1836_v31  ;;  %v2263_v31 = vld [vmem:[#allocation4] sm:$0xff] }
 0xf6c   :  { %3236 = vpow2.f32 %v1838_v48  ;;  %v3039_v25 = vpack.c.bf16 %v3183_v53, %v3182_v54  ;;  %v3061_v51 = vpack.c.bf16 %v2264_v49, %v2263_v31  ;;  %v2624_v49 = vld [vmem:[%s3927_s17] ss:$0 sm:$0xff] }
 0xf6d   :  { %v1940_v27 = vpop.permute.xlu0 %1939 }
 0xf6e   :  { %3040 = vmatprep.subr.bf16.mxu0 %v3039_v25 }
 0xf6f   :  { %3042 = vmatpush3.bf16.msra.mxu0 %v3039_v25 }
 0xf70   :  { %3045 = vmatprep.subr.msk.bf16.mxu0 %vm3548_vm5, %v3043_v55 }
 0xf75   :  { %v3235_v24 = vpop.eup %3234 }
 0xf76   :  { %v3237_v29 = vpop.eup %3236  ;;  %2876 = vmatprep.mubr.msk.f32.mxu0 %vm120_vm0, %v3235_v24  ;;  %v1840_v8 = vsel %vm120_vm0, %v3235_v24, 0.0 }
 0xf77   :  { %2877 = vmatmul.mubr.msk.f32.vlgmr.msra.gmra.mrb[16].mxu0 %vm120_vm0, %v3237_v29 }
 0xf78   :  { %3048 = vmatpush3.bf16.xpose.msk.msra.mxu0 %vm3548_vm5, %v3043_v55  ;;  %2883 = vmatprep.mubr.msk.f32.mxu0 %vm303_vm4, %v1938_v56 }
 0xf79   :  { %3062 = vmatprep.subr.bf16.mxu0 %v3061_v51 }
 0xf7f   :  { %2884 = vmatmul.mubr.msk.f32.vlgmr.msra.gmra.mrb[18].mxu0 %vm303_vm4, %v1940_v27 }
 0xf80   :  { %3064 = vmatpush3.bf16.msra.mxu0 %v3061_v51 }
0x104a   :  { %v3811_v59 = vpop.f32.mrb[16].mxu0 }
0x104b   :  { %v1924_v60 = vpop.f32.mrb[17].mxu0 }
0x1052   :  { %v2885_v63 = vpop.f32.mrb[18].mxu0 }
0x1053   :  { %v2029_v0 = vmul.f32 0.35355338, %v2885_v63  ;;  %v2019_v1 = vpop.f32.mrb[19].mxu0 }
0x1054   :  { %v2028_v2 = vmul.f32 0.35355338, %v2019_v1 }
0x1055   :  { %v2031_v3 = vadd.f32 %v2029_v0, %v3567_v47  ;;  %v1843_v47 = vsel %vm120_vm0, %v3237_v29, 0.0 }
0x1056   :  { %v2030_v4 = vadd.f32 %v2028_v2, %v3572_v50 }
0x1057   :  { %v2035_v5 = vsel %vm120_vm0, %v2031_v3, -inf }
0x1058   :  { %2036 = vmax.xlane.f32.xlu0 %v2035_v5  ;;  %v2032_v34 = vsel %vm120_vm0, %v2030_v4, -inf }
0x1059   :  { %2033 = vmax.xlane.f32.xlu1 %v2032_v34 }
0x105d   :  { %1637 = vadd.xlane.f32.xlu1 %v1636_v6 }
0x1061   :  { %1640 = vadd.xlane.f32.xlu1 %v1639_v7 }
0x1065   :  { %1841 = vadd.xlane.f32.xlu1 %v1840_v8 }
0x1069   :  { %1844 = vadd.xlane.f32.xlu1 %v1843_v47 }
0x106e   :  { %3190 = vrot.lane.b32.xlu0 %v3721_v13, %s3345_s19 }
0x10e5   :  { %v2037_v50 = vpop.xlane.xlu0 %2036 }
0x10e6   :  { %v2039_v9 = vsub.f32 %v2031_v3, %v2037_v50  ;;  %v2034_v10 = vpop.xlane.xlu1 %2033  ;;  %v2265_v50 = vld [vmem:[#allocation4 + $0x10] sm:$0xff] }
0x10e7   :  { %v2038_v11 = vsub.f32 %v2030_v4, %v2034_v10  ;;  %v2357_v10 = vld [vmem:[%s3924_s14] sm:$0xff] }
0x10e8   :  { %v2042_v12 = vmul.f32 1.442695, %v2039_v9  ;;  %v2266_v9 = vld [vmem:[#allocation4 + $0x18] sm:$0xff] }
0x10e9   :  { %v2040_v28 = vmul.f32 1.442695, %v2038_v11  ;;  %v3191_v26 = vpop.permute.xlu0 %3190  ;;  %v2358_v11 = vld [vmem:[%s3924_s14 + $0x8] sm:$0xff] }
0x10ea   :  { %3238 = vpow2.f32 %v2042_v12  ;;  %v3193_v14 = vunpack.i.h.bf16 %v3191_v26  ;;  %v3192_v15 = vunpack.i.l.bf16 %v3191_v26  ;;  %v1638_v18 = vpop.xlane.xlu1 %1637  ;;  %v2359_v12 = vld [vmem:[%s3924_s14 + $0x10] sm:$0xff]  ;;  %v2360_v26 = vld [vmem:[%s3924_s14 + $0x18] sm:$0xff] }
0x10eb   :  { %3240 = vpow2.f32 %v2040_v28  ;;  %v3069_v28 = vpack.c.bf16 %v2358_v11, %v2357_v10 }
0x10ec   :  { %v3049_v17 = vpack.c.bf16 %v3193_v14, %v3192_v15  ;;  %v3073_v14 = vpack.c.bf16 %v2360_v26, %v2359_v12  ;;  %v2361_v15 = vld [vmem:[%s3924_s14 + $0x20] sm:$0xff] }
0x10ee   :  { %3050 = vmatprep.subr.bf16.mxu1 %v3049_v17  ;;  %v1641_v20 = vpop.xlane.xlu1 %1640 }
0x10ef   :  { %3052 = vmatpush3.bf16.msra.mxu1 %v3049_v17  ;;  %v2362_v17 = vld [vmem:[%s3924_s14 + $0x28] sm:$0xff] }
0x10f2   :  { %v1842_v23 = vpop.xlane.xlu1 %1841 }
0x10f3   :  { %3242 = vrcp.f32 %v1842_v23  ;;  %v2363_v23 = vld [vmem:[%s3924_s14 + $0x30] sm:$0xff] }
0x10f4   :  { %v3239_v19 = vpop.eup %3238  ;;  %3244 = vrcp.f32 %v1638_v18  ;;  %v3077_v18 = vpack.c.bf16 %v2362_v17, %v2361_v15 }
0x10f5   :  { %v3241_v21 = vpop.eup %3240  ;;  %v2047_v13 = vsel %vm120_vm0, %v3239_v19, 0.0  ;;  %3246 = vrcp.f32 %v1641_v20 }
0x10f6   :  { %2048 = vadd.xlane.f32.xlu0 %v2047_v13  ;;  %2890 = vmatprep.mubr.msk.f32.mxu1 %vm120_vm0, %v3241_v21  ;;  %v2044_v22 = vsel %vm120_vm0, %v3241_v21, 0.0  ;;  %v1845_v37 = vpop.xlane.xlu1 %1844 }
0x10f7   :  { %2891 = vmatmul.mubr.msk.f32.vlgmr.msra.gmra.mrb[18].mxu1 %vm120_vm0, %v3239_v19  ;;  %2045 = vadd.xlane.f32.xlu1 %v2044_v22  ;;  %3248 = vrcp.f32 %v1845_v37  ;;  %v2615_v19 = vld [vmem:[%s3921_s11] ss:$0 sm:$0xff]  ;;  %v2454_v37 = vld [vmem:[#allocation6] sm:$0xff] }
0x10fb   :  { %1433 = vadd.xlane.f32.xlu1 %v1432_v30  ;;  %v2364_v30 = vld [vmem:[%s3924_s14 + $0x38] sm:$0xff] }
0x10fd   :  { %v3243_v38 = vpop.eup %3242 }
0x10fe   :  { %v1935_v39 = vmul.f32 %v3243_v38, %v1924_v60  ;;  %v3245_v40 = vpop.eup %3244  ;;  %v2455_v38 = vld [vmem:[#allocation6 + $0x8] sm:$0xff] }
0x10ff   :  { %1436 = vadd.xlane.f32.xlu1 %v1435_v36  ;;  %v1731_v41 = vmul.f32 %v3245_v40, %v3791_v35  ;;  %v3247_v42 = vpop.eup %3246  ;;  %v2172_v35 = vld [vmem:[%s3920_s10 + $0x8] sm:$0xff]  ;;  %v3081_v36 = vpack.c.bf16 %v2364_v30, %v2363_v23  ;;  %v2618_v40 = vld [vmem:[%s3923_s13] ss:$0 sm:$0xff] }
0x1100   :  { %v1732_v57 = vmul.f32 %v3247_v42, %v3789_v33  ;;  %v3053_v16 = vpack.c.bf16 %v2172_v35, %v2171_v44  ;;  %v2173_v33 = vld [vmem:[%s3920_s10 + $0x10] sm:$0xff]  ;;  %v2456_v35 = vld [vmem:[#allocation6 + $0x10] sm:$0xff] }
0x1101   :  { %v3249_v43 = vpop.eup %3248  ;;  %v3057_v46 = vpack.c.bf16 %v2174_v32, %v2173_v33  ;;  %v2621_v33 = vld [vmem:[%s3925_s15] ss:$0 sm:$0xff] }
0x1102   :  { %v1936_v58 = vmul.f32 %v3249_v43, %v3811_v59  ;;  %3054 = vmatprep.subr.bf16.mxu1 %v3053_v16 }
0x1103   :  { %3056 = vmatpush3.bf16.msra.mxu1 %v3053_v16  ;;  %v2457_v16 = vld [vmem:[#allocation6 + $0x18] sm:$0xff] }
0x1104   :  { %3058 = vmatprep.subr.bf16.mxu1 %v3057_v46 }
0x1107   :  { %3060 = vmatpush3.bf16.msra.mxu1 %v3057_v46 }
0x1108   :  { %3070 = vmatprep.subr.bf16.mxu1 %v3069_v28 }
0x110c   :  { %2151 = vrot.lane.b32.xlu0 %v1935_v39, %s3346_s12  ;;  %v3085_v39 = vpack.c.bf16 %v2455_v38, %v2454_v37 }
0x1110   :  { %2143 = vrot.lane.b32.xlu1 %v1731_v41, %s3942_s7 }
0x1114   :  { %2145 = vrot.lane.b32.xlu1 %v1732_v57, %s3942_s7 }
0x1118   :  { %2153 = vrot.lane.b32.xlu1 %v1936_v58, %s3346_s12 }
0x1183   :  { %v2049_v48 = vpop.xlane.xlu0 %2048 }
0x1184   :  { %v2046_v45 = vpop.xlane.xlu1 %2045 }
0x1185   :  { %3250 = vrcp.f32 %v2046_v45  ;;  %v3089_v45 = vpack.c.bf16 %v2457_v16, %v2456_v35 }
0x1186   :  { %3252 = vrcp.f32 %v2049_v48 }
0x1187   :  { %v2152_v4 = vpop.permute.xlu0 %2151 }
0x1188   :  { %v1434_v29 = vpop.xlane.xlu1 %1433 }
0x1189   :  { %3254 = vrcp.f32 %v1434_v29 }
0x118c   :  { %v1437_v56 = vpop.xlane.xlu1 %1436 }
0x118d   :  { %3256 = vrcp.f32 %v1437_v56 }
0x118f   :  { %v3251_v53 = vpop.eup %3250 }
0x1190   :  { %v3253_v55 = vpop.eup %3252  ;;  %v2144_v27 = vpop.permute.xlu1 %2143 }
0x1193   :  { %v3255_v59 = vpop.eup %3254 }
0x1194   :  { %v2146_v60 = vpop.permute.xlu1 %2145  ;;  %v1527_v63 = vmul.f32 %v3255_v59, %v3761_v62 }
0x1196   :  { %v2165_v2 = vsel %vm303_vm4, %v1527_v63, %v2144_v27 }
0x1197   :  { %v3257_v0 = vpop.eup %3256  ;;  %v2167_v5 = vsel %vm120_vm0, %v2165_v2, %v2152_v4 }
0x1198   :  { %v2154_v1 = vpop.permute.xlu1 %2153  ;;  %v1528_v3 = vmul.f32 %v3257_v0, %v3759_v61  ;;  %v3065_v61 = vpack.c.bf16 %v2266_v9, %v2265_v50 }
0x119a   :  { %v2166_v6 = vsel %vm303_vm4, %v1528_v3, %v2146_v60  ;;  %3066 = vmatprep.subr.bf16.mxu0 %v3065_v61 }
0x119b   :  { %v2168_v8 = vsel %vm120_vm0, %v2166_v6, %v2154_v1  ;;  %3068 = vmatpush3.bf16.msra.mxu0 %v3065_v61 }
0x119c   :  { %3086 = vmatprep.subr.bf16.mxu0 %v3085_v39 }
0x11ca   :  { %v2892_v52 = vpop.f32.mrb[18].mxu1 }
0x11cb   :  { %v2128_v54 = vpop.f32.mrb[19].mxu1  ;;  %v2140_v24 = vmul.f32 %v3253_v55, %v2892_v52 }
0x11cc   :  { %v2139_v25 = vmul.f32 %v3251_v53, %v2128_v54 }
0x11ce   :  { %2159 = vrot.lane.b32.xlu1 %v2139_v25, %s3347_s6 }
0x11d2   :  { %2161 = vrot.lane.b32.xlu1 %v2140_v24, %s3347_s6 }
0x1240   :  { %v2160_v34 = vpop.permute.xlu1 %2159 }
0x1241   :  { %v2169_v7 = vsel %vm1140_vm6, %v2167_v5, %v2160_v34 }
0x1242   :  { %2901 = vmatprep.mubr.msk.f32.mxu1 %vm215_vm3, %v2169_v7 }
0x1244   :  { %v2162_v47 = vpop.permute.xlu1 %2161 }
0x1245   :  { %v2170_v62 = vsel %vm1140_vm6, %v2168_v8, %v2162_v47 }
0x1246   :  { %2902 = vmatmul.mubr.msk.f32.vlgmr.msra.gmra.mrb[20].mxu1 %vm215_vm3, %v2170_v62 }
0x1247   :  { %3072 = vmatpush3.bf16.msra.mxu1 %v3069_v28 }
0x1248   :  { %3074 = vmatprep.subr.bf16.mxu1 %v3073_v14 }
0x124b   :  { %3076 = vmatpush3.bf16.msra.mxu1 %v3073_v14 }
0x124c   :  { %3078 = vmatprep.subr.bf16.mxu1 %v3077_v18 }
0x124f   :  { %3080 = vmatpush3.bf16.msra.mxu1 %v3077_v18 }
0x1250   :  { %3082 = vmatprep.subr.bf16.mxu1 %v3081_v36 }
0x1253   :  { %3084 = vmatpush3.bf16.msra.mxu1 %v3081_v36 }
0x1319   :  { %v2903_v20 = vpop.f32.mrb[20].mxu1 }
0x131a   :  { %v2254_v21 = vpop.f32.mrb[21].mxu1  ;;  %v2260_v22 = vadd.f32 %v2903_v20, %v2615_v19 }
0x131b   :  { %v2255_v13 = vadd.f32 %v2615_v19, %v2254_v21 }
0x131d   :  { %2912 = vmatprep.mubr.msk.f32.mxu0 %vm215_vm3, %v2255_v13 }
0x131e   :  { %2913 = vmatmul.mubr.msk.f32.vlgmr.msra.gmra.mrb[20].mxu0 %vm215_vm3, %v2260_v22 }
0x131f   :  { %3088 = vmatpush3.bf16.msra.mxu0 %v3085_v39 }
0x1320   :  { %3090 = vmatprep.subr.bf16.mxu0 %v3089_v45 }
0x1323   :  { %3092 = vmatpush3.bf16.msra.mxu0 %v3089_v45 }
0x13f1   :  { %v2914_v41 = vpop.f32.mrb[20].mxu0 }
0x13f2   :  { %v2352_v42 = vadd.f32 %v2914_v41, %v2618_v40  ;;  %v2346_v57 = vpop.f32.mrb[21].mxu0 }
0x13f3   :  { %v2347_v43 = vadd.f32 %v2618_v40, %v2346_v57 }
0x13f4   :  { %v2356_v44 = vmax.f32 %v2352_v42, 0.0 }
0x13f5   :  { %v2355_v58 = vmax.f32 %v2347_v43, 0.0 }
0x13f7   :  { %2931 = vmatprep.mubr.msk.f32.mxu1 %vm2372_vm7, %v2355_v58 }
0x13f8   :  { %2932 = vmatmul.mubr.msk.f32.vlgmr.msra.gmra.mrb[22].mxu1 %vm2372_vm7, %v2356_v44 }
0x14cb   :  { %v2933_v32 = vpop.f32.mrb[22].mxu1 }
0x14cc   :  { %v2445_v46 = vpop.f32.mrb[23].mxu1  ;;  %v2451_v31 = vadd.f32 %v2933_v32, %v2621_v33 }
0x14cd   :  { %v2446_v48 = vadd.f32 %v2621_v33, %v2445_v46 }
0x14cf   :  { %2942 = vmatprep.mubr.msk.f32.mxu0 %vm215_vm3, %v2446_v48 }
0x14d0   :  { %2943 = vmatmul.mubr.msk.f32.vlgmr.msra.gmra.mrb[22].mxu0 %vm215_vm3, %v2451_v31 }
0x15a3   :  { %v2944_v51 = vpop.f32.mrb[22].mxu0 }
0x15a4   :  { %v2543_v52 = vadd.f32 %v2944_v51, %v2624_v49  ;;  %v2537_v53 = vpop.f32.mrb[23].mxu0 }
0x15a5   :  { %v2538_v54 = vadd.f32 %v2624_v49, %v2537_v53 }
0x15a6   :  { %2547 = vst [vmem:[%s3928_s18 + $0x8] sm:$0xff] %v2543_v52 }
0x15a7   :  { %2546 = vst [vmem:[%s3928_s18] sm:$0xff] %v2538_v54 }
0x15a8   :  { %2552 = vsyncpa [#allocation3], 1 }
0x15a9   :  { %2553 = vsyncpa [#allocation5], 1 }

</bundles_post_ra>
